<compile_context>
chip_gen: v7x
topology: tpu7x:2x2x1
jax: 0.10.0
libtpu: 0.0.40
codegen_flags: <defaults>
</compile_context>

<pallas_src>
import jax
import jax.numpy as jnp
from jax import lax
from jax.experimental import pallas as pl
from jax.experimental.pallas import tpu as pltpu

EPS = 1e-3
_MIB = 1024 * 1024


# --------------------------------------------------------------------------
# Small helpers: VMEM footprint estimates + tile selection
# --------------------------------------------------------------------------
def _pad_bytes(shape, itemsize=4):
    """VMEM bytes of an f32 array after (8,128) vreg-tile padding."""
    shape = tuple(int(s) for s in shape)
    if len(shape) == 1:
        shape = (1,) + shape
    lead = 1
    for d in shape[:-2]:
        lead *= d
    sub = -(-shape[-2] // 8) * 8
    lane = -(-shape[-1] // 128) * 128
    return lead * sub * lane * itemsize


def _divisors(n):
    ds, i = set(), 1
    while i * i <= n:
        if n % i == 0:
            ds.add(i)
            ds.add(n // i)
        i += 1
    return sorted(ds)


def _largest_divisor_leq(n, cap, multiple_of=1):
    best = None
    for d in _divisors(n):
        if d <= cap and d % multiple_of == 0:
            best = d
    return best


def _pick_row_band(Ho, Wo, Wp, K, stride, Cin, Cout, budget_bytes=20 * _MIB):
    """Output-row band height TH for pass 1 (divides Ho; lane-dense conv tiles)."""
    KKC = K * K * Cin

    def est(th):
        hb = (th - 1) * stride + K
        e = 2 * _pad_bytes((hb, Wp, Cin))        # input band (double-buffered)
        e += 2 * _pad_bytes((Cout, th * Wo))     # conv output tile (double-buffered)
        e += 2 * _pad_bytes((KKC, Cout))         # weights
        e += _pad_bytes((th * Wo, KKC))          # im2col scratch
        e += 3 * _pad_bytes((th * Wo, Cout))     # matmul result + transpose temps
        return e

    legal = [d for d in _divisors(Ho) if d == Ho or (d * Wo) % 128 == 0]
    if not legal:
        legal = [Ho]
    fitting = [d for d in legal if est(d) <= budget_bytes]
    th = max(fitting) if fitting else min(legal)
    return th, est(th)


def _pick_pass2_tiles(R2, C2, target_bytes=4 * _MIB):
    """Multi-MiB, layout-legal (row, col) tiles for the mem-bound BN/ReLU pass."""
    target = max(1, target_bytes // 4)           # f32 elements per block
    if R2 * C2 <= target:
        return R2, C2
    tc = C2
    if tc > target:
        d = _largest_divisor_leq(C2, target, 128)
        tc = d if d is not None else C2
    tr = _largest_divisor_leq(R2, max(1, target // tc), 8)
    if tr is None:
        tr = R2                                  # full-rows block is always legal
    return tr, tc


# --------------------------------------------------------------------------
# Pass 1: conv (one MXU matmul via in-kernel im2col) + per-channel stats
# --------------------------------------------------------------------------
def _make_conv_stats_kernel(K, TH, Wo, stride, Cin):
    def kernel(x_ref, w_ref, conv_ref, stats_ref, lhs_ref):
        # x_ref:    (Hb, Wp, Cin)      padded NHWC input row band (with halo)
        # w_ref:    (K*K*Cin, Cout)    im2col weight matrix
        # conv_ref: (Cout, TH*Wo)      conv tile, NCHW-flat (lane-dense store)
        # stats_ref:(2, Cout)          [sum, sum_of_squares] over this tile
        # lhs_ref:  (TH*Wo, K*K*Cin)   VMEM scratch: im2col patch matrix
        for kh in range(K):
            for kw in range(K):
                if stride == 1:
                    xs = x_ref[kh:kh + TH, kw:kw + Wo, :]
                else:
                    xs = x_ref[pl.ds(kh, TH, stride), pl.ds(kw, Wo, stride), :]
                tap = kh * K + kw
                lhs_ref[:, tap * Cin:(tap + 1) * Cin] = xs.reshape(TH * Wo, Cin)

        # Single MXU contraction over K*K*Cin (vs. K*K tiny matmuls before).
        acc = jnp.dot(lhs_ref[...], w_ref[...],
                      preferred_element_type=jnp.float32)        # (TH*Wo, Cout)

        # In-kernel transpose (XLU) -> lane-dense store, output already NCHW-flat.
        conv_ref[...] = acc.T.astype(conv_ref.dtype)

        s = jnp.sum(acc, axis=0, keepdims=True)                  # (1, Cout)
        ss = jnp.sum(acc * acc, axis=0, keepdims=True)           # (1, Cout)
        stats_ref[...] = jnp.concatenate([s, ss], axis=0)        # single store

    return kernel


# --------------------------------------------------------------------------
# Pass 2: y = relu(x * scale + shift) on the (N*Cout, Ho*Wo) NCHW-flat view
# --------------------------------------------------------------------------
def _bn_relu_kernel(x_ref, scale_ref, shift_ref, o_ref):
    # x_ref/o_ref: (TR, TC) tile; scale/shift: (TR, 1) per-row (= per-channel).
    y = x_ref[...].astype(jnp.float32) * scale_ref[...] + shift_ref[...]
    o_ref[...] = jnp.maximum(y, 0.0).astype(o_ref.dtype)


# --------------------------------------------------------------------------
# Wrapper
# --------------------------------------------------------------------------
def cbr_forward(x, weight, gamma, beta, *, stride=1, eps=EPS):
    """Conv2d(bias=False, padding=(K-1)//2) + BatchNorm2d(batch stats) + ReLU.

    x:      (N, Cin, H, W)      weight: (Cout, Cin, K, K)
    gamma, beta: (Cout,)        returns (N, Cout, Ho, Wo)
    """
    N, Cin, H, W = x.shape
    Cout, Cin_w, K, K2 = weight.shape
    assert Cin == Cin_w and K == K2
    pad = (K - 1) // 2
    Ho = (H + 2 * pad - K) // stride + 1
    Wo = (W + 2 * pad - K) // stride + 1
    Hp, Wp = H + 2 * pad, W + 2 * pad
    KKC = K * K * Cin

    # NCHW -> NHWC + zero pad (Cin on MXU lanes for the contraction).
    # TODO(synk): could be absorbed into pass 1 (allow_input_fusion / NHWC-native
    #             boundary); kept in XLA since the input is the small tensor here.
    x_pad = jnp.pad(jnp.transpose(x, (0, 2, 3, 1)),
                    ((0, 0), (pad, pad), (pad, pad), (0, 0)))
    # OIHW -> (kh*kw*cin, cout), matching the kernel's im2col tap order.
    w_mat = jnp.transpose(weight, (2, 3, 1, 0)).reshape(KKC, Cout)

    # ---- pass-1 spatial row-band tiling (bounds per-step VMEM; v7x = 64 MiB) ---
    TH, est1 = _pick_row_band(Ho, Wo, Wp, K, stride, Cin, Cout)
    nT = Ho // TH
    Hb = (TH - 1) * stride + K
    band_starts = [t * TH * stride for t in range(nT)]
    x_bands = jnp.stack([x_pad[:, s:s + Hb] for s in band_starts], axis=1)

    vmem1 = int(min(48 * _MIB, max(16 * _MIB, 2 * est1)))
    conv_out, stats = pl.pallas_call(
        _make_conv_stats_kernel(K, TH, Wo, stride, Cin),
        out_shape=(jax.ShapeDtypeStruct((N, Cout, Ho * Wo), jnp.float32),
                   jax.ShapeDtypeStruct((N, nT, 2, Cout), jnp.float32)),
        grid_spec=pltpu.PrefetchScalarGridSpec(
            num_scalar_prefetch=0,
            grid=(N, nT),
            in_specs=[
                pl.BlockSpec((None, None, Hb, Wp, Cin),
                             lambda n, t: (n, t, 0, 0, 0)),
                pl.BlockSpec((KKC, Cout), lambda n, t: (0, 0)),
            ],
            out_specs=[
                pl.BlockSpec((None, Cout, TH * Wo), lambda n, t: (n, 0, t)),
                pl.BlockSpec((None, None, 2, Cout), lambda n, t: (n, t, 0, 0)),
            ],
            scratch_shapes=[pltpu.VMEM((TH * Wo, KKC), x_pad.dtype)]),
        compiler_params=pltpu.CompilerParams(
            dimension_semantics=("parallel", "parallel"),
            vmem_limit_bytes=vmem1),
    )(x_bands, w_mat)

    # ---- batch statistics -> per-channel scale / shift (tiny XLA glue) --------
    cnt = jnp.float32(N * Ho * Wo)
    s = jnp.sum(stats[:, :, 0, :], axis=(0, 1))
    ss = jnp.sum(stats[:, :, 1, :], axis=(0, 1))
    mean = s / cnt
    var = jnp.maximum(ss / cnt - mean * mean, 0.0)
    scale = gamma.astype(jnp.float32) * lax.rsqrt(var + eps)
    shift = beta.astype(jnp.float32) - mean * scale
    # TODO(synk): running_mean/running_var momentum update not emitted.

    # ---- pass 2: BN affine + ReLU in the native NCHW-flat layout --------------
    R2, C2 = N * Cout, Ho * Wo
    x2 = conv_out.reshape(R2, C2)                       # leading-dim merge: free
    sc = jnp.tile(scale, N).reshape(R2, 1)              # per-row scale (row = n*Cout+c)
    sh = jnp.tile(shift, N).reshape(R2, 1)
    TR, TC = _pick_pass2_tiles(R2, C2)
    est2 = 4 * _pad_bytes((TR, TC)) + 4 * _pad_bytes((TR, 1))
    vmem2 = int(min(48 * _MIB, max(16 * _MIB, 2 * est2)))

    out2 = pl.pallas_call(
        _bn_relu_kernel,
        out_shape=jax.ShapeDtypeStruct((R2, C2), jnp.float32),
        grid_spec=pltpu.PrefetchScalarGridSpec(
            num_scalar_prefetch=0,
            grid=(R2 // TR, C2 // TC),
            in_specs=[
                pl.BlockSpec((TR, TC), lambda i, j: (i, j)),
                pl.BlockSpec((TR, 1), lambda i, j: (i, 0)),
                pl.BlockSpec((TR, 1), lambda i, j: (i, 0)),
            ],
            out_specs=pl.BlockSpec((TR, TC), lambda i, j: (i, j))),
        input_output_aliases={0: 0},                    # conv_out is dead after this
        compiler_params=pltpu.CompilerParams(
            dimension_semantics=("parallel", "parallel"),
            vmem_limit_bytes=vmem2),
    )(x2, sc, sh)

    out = out2.reshape(N, Cout, Ho, Wo)                 # minor dims intact: free
    return out if out.dtype == x.dtype else out.astype(x.dtype)


# --------------------------------------------------------------------------
# Pure-JAX reference
# --------------------------------------------------------------------------
def _reference(x, weight, gamma, beta, stride, padding, eps=EPS):
    y = lax.conv_general_dilated(
        x, weight, window_strides=(stride, stride),
        padding=((padding, padding), (padding, padding)),
        dimension_numbers=("NCHW", "OIHW", "NCHW"),
        precision=lax.Precision.HIGHEST)
    mean = jnp.mean(y, axis=(0, 2, 3), keepdims=True)
    var = jnp.mean((y - mean) ** 2, axis=(0, 2, 3), keepdims=True)
    yn = (y - mean) * lax.rsqrt(var + eps)
    yn = yn * gamma.reshape(1, -1, 1, 1) + beta.reshape(1, -1, 1, 1)
    return jnp.maximum(yn, 0.0)


if __name__ == "__main__":
    key = jax.random.PRNGKey(0)
    kx, kw, kg, kb = jax.random.split(key, 4)

    N, Cin, H, W = 2, 4, 16, 16
    Cout, K, stride = 8, 3, 1

    x = jax.random.normal(kx, (N, Cin, H, W), dtype=jnp.float32)
    weight = jax.random.normal(kw, (Cout, Cin, K, K), dtype=jnp.float32)
    weight = weight * (2.0 / (Cin * K * K)) ** 0.5
    gamma = 1.0 + 0.1 * jax.random.normal(kg, (Cout,), dtype=jnp.float32)
    beta = 0.1 * jax.random.normal(kb, (Cout,), dtype=jnp.float32)

    fwd = jax.jit(lambda x, w, g, b: cbr_forward(x, w, g, b, stride=stride))
    out = jax.block_until_ready(fwd(x, weight, gamma, beta))

    ref = _reference(x, weight, gamma, beta, stride, (K - 1) // 2)
    assert out.shape == (N, Cout, H, W)
    # Tolerance covers MXU pass-precision and the single-pass variance formula.
    assert jnp.allclose(out, ref, atol=1e-2, rtol=1e-2), "mismatch vs reference"

    print("KERNEL_OK")
</pallas_src>

<mosaic_0001>
module attributes {stable_mosaic.version = 11 : i64} {
  func.func @kernel(%arg0: i32, %arg1: i32, %arg2: memref<1x1x18x18x4xf32, #tpu.memory_space<vmem>>, %arg3: memref<36x8xf32, #tpu.memory_space<vmem>>, %arg4: memref<1x8x256xf32, #tpu.memory_space<vmem>>, %arg5: memref<1x1x2x8xf32, #tpu.memory_space<vmem>>, %arg6: memref<256x36xf32, #tpu.memory_space<vmem>>) attributes {dimension_semantics = [#tpu.dimension_semantics<parallel>, #tpu.dimension_semantics<parallel>], iteration_bounds = array<i64: 2, 1>, scalar_prefetch = 0 : i64, scratch_operands = 1 : i64, tpu.core_type = #tpu.core_type<tc>, window_params = [{transform_indices = @transform_0, window_bounds = array<i64: 1, 1, 18, 18, 4>}, {pipeline_mode = #tpu.pipeline_mode<synchronous>, transform_indices = @transform_1, window_bounds = array<i64: 36, 8>}, {transform_indices = @transform_2, window_bounds = array<i64: 1, 8, 256>}, {transform_indices = @transform_3, window_bounds = array<i64: 1, 1, 2, 8>}]} {
    %c0 = arith.constant 0 : index
    %c0_0 = arith.constant 0 : index
    %c0_1 = arith.constant 0 : index
    %c0_2 = arith.constant 0 : index
    %c0_3 = arith.constant 0 : index
    %0 = vector.load %arg2[%c0, %c0_0, %c0_1, %c0_2, %c0_3] : memref<1x1x18x18x4xf32, #tpu.memory_space<vmem>>, vector<1x1x16x16x4xf32>
    %1 = vector.shape_cast %0 : vector<1x1x16x16x4xf32> to vector<16x16x4xf32>
    %2 = vector.shape_cast %1 : vector<16x16x4xf32> to vector<256x4xf32>
    %c0_4 = arith.constant 0 : index
    %c0_5 = arith.constant 0 : index
    %3 = vector.load %arg6[%c0_4, %c0_5] : memref<256x36xf32, #tpu.memory_space<vmem>>, vector<256x4xf32>
    tpu.vector_store %arg6[%c0_4, %c0_5], %2 {strides = array<i32>} : memref<256x36xf32, #tpu.memory_space<vmem>>, vector<256x4xf32>,
    %c0_6 = arith.constant 0 : index
    %c0_7 = arith.constant 0 : index
    %c0_8 = arith.constant 0 : index
    %c1 = arith.constant 1 : index
    %c0_9 = arith.constant 0 : index
    %4 = vector.load %arg2[%c0_6, %c0_7, %c0_8, %c1, %c0_9] : memref<1x1x18x18x4xf32, #tpu.memory_space<vmem>>, vector<1x1x16x16x4xf32>
    %5 = vector.shape_cast %4 : vector<1x1x16x16x4xf32> to vector<16x16x4xf32>
    %6 = vector.shape_cast %5 : vector<16x16x4xf32> to vector<256x4xf32>
    %c0_10 = arith.constant 0 : index
    %c4 = arith.constant 4 : index
    %7 = vector.load %arg6[%c0_10, %c4] : memref<256x36xf32, #tpu.memory_space<vmem>>, vector<256x4xf32>
    tpu.vector_store %arg6[%c0_10, %c4], %6 {strides = array<i32>} : memref<256x36xf32, #tpu.memory_space<vmem>>, vector<256x4xf32>,
    %c0_11 = arith.constant 0 : index
    %c0_12 = arith.constant 0 : index
    %c0_13 = arith.constant 0 : index
    %c2 = arith.constant 2 : index
    %c0_14 = arith.constant 0 : index
    %8 = vector.load %arg2[%c0_11, %c0_12, %c0_13, %c2, %c0_14] : memref<1x1x18x18x4xf32, #tpu.memory_space<vmem>>, vector<1x1x16x16x4xf32>
    %9 = vector.shape_cast %8 : vector<1x1x16x16x4xf32> to vector<16x16x4xf32>
    %10 = vector.shape_cast %9 : vector<16x16x4xf32> to vector<256x4xf32>
    %c0_15 = arith.constant 0 : index
    %c8 = arith.constant 8 : index
    %11 = vector.load %arg6[%c0_15, %c8] : memref<256x36xf32, #tpu.memory_space<vmem>>, vector<256x4xf32>
    tpu.vector_store %arg6[%c0_15, %c8], %10 {strides = array<i32>} : memref<256x36xf32, #tpu.memory_space<vmem>>, vector<256x4xf32>,
    %c0_16 = arith.constant 0 : index
    %c0_17 = arith.constant 0 : index
    %c1_18 = arith.constant 1 : index
    %c0_19 = arith.constant 0 : index
    %c0_20 = arith.constant 0 : index
    %12 = vector.load %arg2[%c0_16, %c0_17, %c1_18, %c0_19, %c0_20] : memref<1x1x18x18x4xf32, #tpu.memory_space<vmem>>, vector<1x1x16x16x4xf32>
    %13 = vector.shape_cast %12 : vector<1x1x16x16x4xf32> to vector<16x16x4xf32>
    %14 = vector.shape_cast %13 : vector<16x16x4xf32> to vector<256x4xf32>
    %c0_21 = arith.constant 0 : index
    %c12 = arith.constant 12 : index
    %15 = vector.load %arg6[%c0_21, %c12] : memref<256x36xf32, #tpu.memory_space<vmem>>, vector<256x4xf32>
    tpu.vector_store %arg6[%c0_21, %c12], %14 {strides = array<i32>} : memref<256x36xf32, #tpu.memory_space<vmem>>, vector<256x4xf32>,
    %c0_22 = arith.constant 0 : index
    %c0_23 = arith.constant 0 : index
    %c1_24 = arith.constant 1 : index
    %c1_25 = arith.constant 1 : index
    %c0_26 = arith.constant 0 : index
    %16 = vector.load %arg2[%c0_22, %c0_23, %c1_24, %c1_25, %c0_26] : memref<1x1x18x18x4xf32, #tpu.memory_space<vmem>>, vector<1x1x16x16x4xf32>
    %17 = vector.shape_cast %16 : vector<1x1x16x16x4xf32> to vector<16x16x4xf32>
    %18 = vector.shape_cast %17 : vector<16x16x4xf32> to vector<256x4xf32>
    %c0_27 = arith.constant 0 : index
    %c16 = arith.constant 16 : index
    %19 = vector.load %arg6[%c0_27, %c16] : memref<256x36xf32, #tpu.memory_space<vmem>>, vector<256x4xf32>
    tpu.vector_store %arg6[%c0_27, %c16], %18 {strides = array<i32>} : memref<256x36xf32, #tpu.memory_space<vmem>>, vector<256x4xf32>,
    %c0_28 = arith.constant 0 : index
    %c0_29 = arith.constant 0 : index
    %c1_30 = arith.constant 1 : index
    %c2_31 = arith.constant 2 : index
    %c0_32 = arith.constant 0 : index
    %20 = vector.load %arg2[%c0_28, %c0_29, %c1_30, %c2_31, %c0_32] : memref<1x1x18x18x4xf32, #tpu.memory_space<vmem>>, vector<1x1x16x16x4xf32>
    %21 = vector.shape_cast %20 : vector<1x1x16x16x4xf32> to vector<16x16x4xf32>
    %22 = vector.shape_cast %21 : vector<16x16x4xf32> to vector<256x4xf32>
    %c0_33 = arith.constant 0 : index
    %c20 = arith.constant 20 : index
    %23 = vector.load %arg6[%c0_33, %c20] : memref<256x36xf32, #tpu.memory_space<vmem>>, vector<256x4xf32>
    tpu.vector_store %arg6[%c0_33, %c20], %22 {strides = array<i32>} : memref<256x36xf32, #tpu.memory_space<vmem>>, vector<256x4xf32>,
    %c0_34 = arith.constant 0 : index
    %c0_35 = arith.constant 0 : index
    %c2_36 = arith.constant 2 : index
    %c0_37 = arith.constant 0 : index
    %c0_38 = arith.constant 0 : index
    %24 = vector.load %arg2[%c0_34, %c0_35, %c2_36, %c0_37, %c0_38] : memref<1x1x18x18x4xf32, #tpu.memory_space<vmem>>, vector<1x1x16x16x4xf32>
    %25 = vector.shape_cast %24 : vector<1x1x16x16x4xf32> to vector<16x16x4xf32>
    %26 = vector.shape_cast %25 : vector<16x16x4xf32> to vector<256x4xf32>
    %c0_39 = arith.constant 0 : index
    %c24 = arith.constant 24 : index
    %27 = vector.load %arg6[%c0_39, %c24] : memref<256x36xf32, #tpu.memory_space<vmem>>, vector<256x4xf32>
    tpu.vector_store %arg6[%c0_39, %c24], %26 {strides = array<i32>} : memref<256x36xf32, #tpu.memory_space<vmem>>, vector<256x4xf32>,
    %c0_40 = arith.constant 0 : index
    %c0_41 = arith.constant 0 : index
    %c2_42 = arith.constant 2 : index
    %c1_43 = arith.constant 1 : index
    %c0_44 = arith.constant 0 : index
    %28 = vector.load %arg2[%c0_40, %c0_41, %c2_42, %c1_43, %c0_44] : memref<1x1x18x18x4xf32, #tpu.memory_space<vmem>>, vector<1x1x16x16x4xf32>
    %29 = vector.shape_cast %28 : vector<1x1x16x16x4xf32> to vector<16x16x4xf32>
    %30 = vector.shape_cast %29 : vector<16x16x4xf32> to vector<256x4xf32>
    %c0_45 = arith.constant 0 : index
    %c28 = arith.constant 28 : index
    %31 = vector.load %arg6[%c0_45, %c28] : memref<256x36xf32, #tpu.memory_space<vmem>>, vector<256x4xf32>
    tpu.vector_store %arg6[%c0_45, %c28], %30 {strides = array<i32>} : memref<256x36xf32, #tpu.memory_space<vmem>>, vector<256x4xf32>,
    %c0_46 = arith.constant 0 : index
    %c0_47 = arith.constant 0 : index
    %c2_48 = arith.constant 2 : index
    %c2_49 = arith.constant 2 : index
    %c0_50 = arith.constant 0 : index
    %32 = vector.load %arg2[%c0_46, %c0_47, %c2_48, %c2_49, %c0_50] : memref<1x1x18x18x4xf32, #tpu.memory_space<vmem>>, vector<1x1x16x16x4xf32>
    %33 = vector.shape_cast %32 : vector<1x1x16x16x4xf32> to vector<16x16x4xf32>
    %34 = vector.shape_cast %33 : vector<16x16x4xf32> to vector<256x4xf32>
    %c0_51 = arith.constant 0 : index
    %c32 = arith.constant 32 : index
    %35 = vector.load %arg6[%c0_51, %c32] : memref<256x36xf32, #tpu.memory_space<vmem>>, vector<256x4xf32>
    tpu.vector_store %arg6[%c0_51, %c32], %34 {strides = array<i32>} : memref<256x36xf32, #tpu.memory_space<vmem>>, vector<256x4xf32>,
    %c0_52 = arith.constant 0 : index
    %c0_53 = arith.constant 0 : index
    %36 = vector.load %arg6[%c0_52, %c0_53] : memref<256x36xf32, #tpu.memory_space<vmem>>, vector<256x36xf32>
    %c0_54 = arith.constant 0 : index
    %c0_55 = arith.constant 0 : index
    %37 = vector.load %arg3[%c0_54, %c0_55] : memref<36x8xf32, #tpu.memory_space<vmem>>, vector<36x8xf32>
    %cst = arith.constant dense<0.000000e+00> : vector<256x8xf32>
    %38 = tpu.matmul %36, %37, %cst {dimension_numbers = #tpu.dot_dimension_numbers<[1], [0], [0], [1], [0, 0, 1, 1], [], []>} : vector<256x36xf32>, vector<36x8xf32>, vector<256x8xf32> -> vector<256x8xf32>
    %39 = tpu.transpose %38, [1, 0] : vector<256x8xf32> -> vector<8x256xf32>
    %c0_56 = arith.constant 0 : index
    %c0_57 = arith.constant 0 : index
    %c0_58 = arith.constant 0 : index
    %40 = vector.load %arg4[%c0_56, %c0_57, %c0_58] : memref<1x8x256xf32, #tpu.memory_space<vmem>>, vector<1x8x256xf32>
    %41 = vector.shape_cast %40 : vector<1x8x256xf32> to vector<8x256xf32>
    %42 = vector.shape_cast %39 : vector<8x256xf32> to vector<1x8x256xf32>
    tpu.vector_store %arg4[%c0_56, %c0_57, %c0_58], %42 {strides = array<i32>} : memref<1x8x256xf32, #tpu.memory_space<vmem>>, vector<1x8x256xf32>,
    %cst_59 = arith.constant dense<0.000000e+00> : vector<8xf32>
    %43 = vector.multi_reduction <add>, %38, %cst_59 [0] : vector<256x8xf32> to vector<8xf32>
    %44 = vector.shape_cast %43 : vector<8xf32> to vector<1x8xf32>
    %45 = arith.mulf %38, %38 : vector<256x8xf32>
    %cst_60 = arith.constant dense<0.000000e+00> : vector<8xf32>
    %46 = vector.multi_reduction <add>, %45, %cst_60 [0] : vector<256x8xf32> to vector<8xf32>
    %47 = vector.shape_cast %46 : vector<8xf32> to vector<1x8xf32>
    %48 = tpu.concatenate %44, %47 in 0 : vector<1x8xf32>, vector<1x8xf32> -> vector<2x8xf32>
    %c0_61 = arith.constant 0 : index
    %c0_62 = arith.constant 0 : index
    %c0_63 = arith.constant 0 : index
    %c0_64 = arith.constant 0 : index
    %49 = vector.load %arg5[%c0_61, %c0_62, %c0_63, %c0_64] : memref<1x1x2x8xf32, #tpu.memory_space<vmem>>, vector<1x1x2x8xf32>
    %50 = vector.shape_cast %49 : vector<1x1x2x8xf32> to vector<2x8xf32>
    %51 = vector.shape_cast %48 : vector<2x8xf32> to vector<1x1x2x8xf32>
    tpu.vector_store %arg5[%c0_61, %c0_62, %c0_63, %c0_64], %51 {strides = array<i32>} : memref<1x1x2x8xf32, #tpu.memory_space<vmem>>, vector<1x1x2x8xf32>,
    return
  }
  func.func @transform_0(%arg0: i32, %arg1: i32) -> (i32, i32, i32, i32, i32) {
    %c0_i32 = arith.constant 0 : i32
    %c0_i32_0 = arith.constant 0 : i32
    %c0_i32_1 = arith.constant 0 : i32
    %c0_i32_2 = arith.constant 0 : i32
    return %arg0, %arg1, %c0_i32, %c0_i32_0, %c0_i32_1 : i32, i32, i32, i32, i32
  }
  func.func @transform_1(%arg0: i32, %arg1: i32) -> (i32, i32) {
    %c0_i32 = arith.constant 0 : i32
    %c0_i32_0 = arith.constant 0 : i32
    %c0_i32_1 = arith.constant 0 : i32
    return %c0_i32, %c0_i32_0 : i32, i32
  }
  func.func @transform_2(%arg0: i32, %arg1: i32) -> (i32, i32, i32) {
    %c0_i32 = arith.constant 0 : i32
    %c0_i32_0 = arith.constant 0 : i32
    return %arg0, %c0_i32, %arg1 : i32, i32, i32
  }
  func.func @transform_3(%arg0: i32, %arg1: i32) -> (i32, i32, i32, i32) {
    %c0_i32 = arith.constant 0 : i32
    %c0_i32_0 = arith.constant 0 : i32
    %c0_i32_1 = arith.constant 0 : i32
    return %arg0, %arg1, %c0_i32, %c0_i32_0 : i32, i32, i32, i32
  }
}

module attributes {stable_mosaic.version = 11 : i64} {
  func.func @_bn_relu_kernel(%arg0: i32, %arg1: i32, %arg2: memref<16x256xf32, #tpu.memory_space<vmem>>, %arg3: memref<16x1xf32, #tpu.memory_space<vmem>>, %arg4: memref<16x1xf32, #tpu.memory_space<vmem>>, %arg5: memref<16x256xf32, #tpu.memory_space<vmem>>) attributes {dimension_semantics = [#tpu.dimension_semantics<parallel>, #tpu.dimension_semantics<parallel>], iteration_bounds = array<i64: 1, 1>, scalar_prefetch = 0 : i64, scratch_operands = 0 : i64, tpu.core_type = #tpu.core_type<tc>, window_params = [{transform_indices = @transform_0, window_bounds = array<i64: 16, 256>}, {transform_indices = @transform_1, window_bounds = array<i64: 16, 1>}, {transform_indices = @transform_2, window_bounds = array<i64: 16, 1>}, {transform_indices = @transform_3, window_bounds = array<i64: 16, 256>}]} {
    %c0 = arith.constant 0 : index
    %c0_0 = arith.constant 0 : index
    %0 = vector.load %arg2[%c0, %c0_0] : memref<16x256xf32, #tpu.memory_space<vmem>>, vector<16x256xf32>
    %c0_1 = arith.constant 0 : index
    %c0_2 = arith.constant 0 : index
    %1 = vector.load %arg3[%c0_1, %c0_2] : memref<16x1xf32, #tpu.memory_space<vmem>>, vector<16x1xf32>
    %2 = vector.broadcast %1 : vector<16x1xf32> to vector<16x256xf32>
    %3 = arith.mulf %0, %2 : vector<16x256xf32>
    %c0_3 = arith.constant 0 : index
    %c0_4 = arith.constant 0 : index
    %4 = vector.load %arg4[%c0_3, %c0_4] : memref<16x1xf32, #tpu.memory_space<vmem>>, vector<16x1xf32>
    %5 = vector.broadcast %4 : vector<16x1xf32> to vector<16x256xf32>
    %6 = arith.addf %3, %5 : vector<16x256xf32>
    %cst = arith.constant 0.000000e+00 : f32
    %7 = vector.broadcast %cst : f32 to vector<16x256xf32>
    %8 = arith.maximumf %6, %7 : vector<16x256xf32>
    %c0_5 = arith.constant 0 : index
    %c0_6 = arith.constant 0 : index
    %9 = vector.load %arg5[%c0_5, %c0_6] : memref<16x256xf32, #tpu.memory_space<vmem>>, vector<16x256xf32>
    tpu.vector_store %arg5[%c0_5, %c0_6], %8 {strides = array<i32>} : memref<16x256xf32, #tpu.memory_space<vmem>>, vector<16x256xf32>,
    return
  }
  func.func @transform_0(%arg0: i32, %arg1: i32) -> (i32, i32) {
    %c0_i32 = arith.constant 0 : i32
    return %arg0, %arg1 : i32, i32
  }
  func.func @transform_1(%arg0: i32, %arg1: i32) -> (i32, i32) {
    %c0_i32 = arith.constant 0 : i32
    %c0_i32_0 = arith.constant 0 : i32
    return %arg0, %c0_i32 : i32, i32
  }
  func.func @transform_2(%arg0: i32, %arg1: i32) -> (i32, i32) {
    %c0_i32 = arith.constant 0 : i32
    %c0_i32_0 = arith.constant 0 : i32
    return %arg0, %c0_i32 : i32, i32
  }
  func.func @transform_3(%arg0: i32, %arg1: i32) -> (i32, i32) {
    %c0_i32 = arith.constant 0 : i32
    return %arg0, %arg1 : i32, i32
  }
}

</mosaic_0001>

<bundles_post_ra>
// kernel: tile.13
= control target key start
LH: loop header
LB: loop body
LE: loop exit
PB: predicated region body
PF: predicated region fallthrough
CT: control target
= control target key end

     0   :  { %s22_s0 = inlined_call_operand.vmem [shape: f32[8], index: 0, kind: input, shape index: {}]   ;;  %s23_s1 = inlined_call_operand.vmem [shape: f32[2,8], index: 1, kind: output, shape index: {}]  }
   0x1   :  { %v4_v0 = vld [vmem:[%s22_s0] ss:$0 sm:$0xff] }
   0x2   :  { %5 = vst [vmem:[%s23_s1] sm:$0x3] %v4_v0 }

// kernel: tile.0
= control target key start
LH: loop header
LB: loop body
LE: loop exit
PB: predicated region body
PF: predicated region fallthrough
CT: control target
= control target key end

     0   :  { %s66_s8 = smov 125   ;;  %vm7_vm0 = vcmask 7168   ;;  %s67_s11 = smov 126   ;;  %s117_s0 = inlined_call_operand.vmem [shape: f32[2,8], index: 0, kind: input, shape index: {}]   ;;  %s118_s1 = inlined_call_operand.vmem [shape: f32[16,1], index: 1, kind: output, shape index: {}]  }
   0x1   :  { %v4_v0 = vld [vmem:[%s117_s0] sm:$0x3]  ;;  %s65_s0 = smov 127   ;;  %s68_s12 = smov 124  }
   0x2   :  { %5 = vst [vmem:[#allocation0] sm:$0x3] %v4_v0  ;;  %s69_s13 = smov 123   ;;  %s70_s14 = smov 122  }
   0x3   :  { %s71_s15 = smov 121  }
   0x9   :  { %v9_v1 = vld [vmem:[#allocation0] sm:$0x3]  }
   0xa   :  { %v21_v2 = vld [vmem:[#allocation0] sm:$0x3]   ;;  %10 = vrot.lane.b32.xlu0 %v9_v1, %s65_s0 }
   0xb   :  { %22 = vrot.lane.b32.xlu1 %v21_v2, %s66_s8  ;;  %v15_v3 = vld [vmem:[#allocation0] sm:$0x3]  }
   0xc   :  { %v27_v4 = vld [vmem:[#allocation0] sm:$0x3]  }
   0xd   :  { %v6_v5 = vld [vmem:[#allocation0] sm:$0x3]  }
   0xe   :  { %8 = vst.msk [vmem:[%s118_s1] ss:$8 sm:$0x3] %vm7_vm0, %v6_v5   ;;  %16 = vrot.lane.b32.xlu0 %v15_v3, %s67_s11  ;;  %v33_v6 = vld [vmem:[#allocation0] sm:$0x3]  }
   0xf   :  { %28 = vrot.lane.b32.xlu1 %v27_v4, %s68_s12  ;;  %v39_v7 = vld [vmem:[#allocation0] sm:$0x3]  }
  0x10   :  { %v45_v8 = vld [vmem:[#allocation0] sm:$0x3]  }
  0x12   :  { %34 = vrot.lane.b32.xlu0 %v33_v6, %s69_s13 }
  0x13   :  { %40 = vrot.lane.b32.xlu1 %v39_v7, %s70_s14 }
  0x16   :  { %46 = vrot.lane.b32.xlu0 %v45_v8, %s71_s15 }
  0x7c   :  { %v11_v9 = vpop.permute.xlu0 %10  }
  0x7d   :  { %v23_v10 = vpop.permute.xlu1 %22   ;;  %51 = vst.msk [vmem:[%s118_s1 + $0x1] ss:$8 sm:$0x3] %vm7_vm0, %v11_v9  }
  0x7e   :  { %53 = vst.msk [vmem:[%s118_s1 + $0x3] ss:$8 sm:$0x3] %vm7_vm0, %v23_v10  }
  0x80   :  { %v17_v11 = vpop.permute.xlu0 %16  }
  0x81   :  { %v29_v12 = vpop.permute.xlu1 %28   ;;  %52 = vst.msk [vmem:[%s118_s1 + $0x2] ss:$8 sm:$0x3] %vm7_vm0, %v17_v11  }
  0x82   :  { %54 = vst.msk [vmem:[%s118_s1 + $0x4] ss:$8 sm:$0x3] %vm7_vm0, %v29_v12  }
  0x84   :  { %v35_v13 = vpop.permute.xlu0 %34  }
  0x85   :  { %v41_v14 = vpop.permute.xlu1 %40   ;;  %55 = vst.msk [vmem:[%s118_s1 + $0x5] ss:$8 sm:$0x3] %vm7_vm0, %v35_v13  }
  0x86   :  { %56 = vst.msk [vmem:[%s118_s1 + $0x6] ss:$8 sm:$0x3] %vm7_vm0, %v41_v14  }
  0x88   :  { %v47_v15 = vpop.permute.xlu0 %46  }
  0x89   :  { %57 = vst.msk [vmem:[%s118_s1 + $0x7] ss:$8 sm:$0x3] %vm7_vm0, %v47_v15  }

// kernel: _lambda_.3
= control target key start
LH: loop header
LB: loop body
LE: loop exit
PB: predicated region body
PF: predicated region fallthrough
CT: control target
= control target key end

     0   :  { %v65_v0 = vmov 0   ;;  %s122_s2 = inlined_call_operand.vmem [shape: f32[16,1], index: 2, kind: input, shape index: {}]   ;;  %s123_s1 = inlined_call_operand.vmem [shape: f32[16,1], index: 1, kind: input, shape index: {}]   ;;  %s124_s0 = inlined_call_operand.vmem [shape: f32[16,256], index: 0, kind: input, shape index: {}, may-alias: {0,3}]   ;;  %s125_s3 = inlined_call_operand.vmem [shape: f32[16,256], index: 3, kind: output, shape index: {}, may-alias: {0,3}]  }
   0x1   :  { %64 = vset.pattern.permute.xlu1 %v65_v0  ;;  %63 = vset.pattern.permute.xlu0 %v65_v0  ;;  %v34_v1 = vld [vmem:[%s122_s2] sm:$0xff]  ;;  %v35_v3 = vld [vmem:[%s122_s2 + $0x8] sm:$0xff]  ;;  %v16_v11 = vld [vmem:[%s124_s0 + $0x10] sm:$0xff] }
   0x2   :  { %v18_v2 = vld [vmem:[%s123_s1] sm:$0xff]  ;;  %38 = vperm.xlu1 %64, %v34_v1   ;;  %v19_v4 = vld [vmem:[%s123_s1 + $0x8] sm:$0xff]  ;;  %v17_v12 = vld [vmem:[%s124_s0 + $0x18] sm:$0xff] }
   0x3   :  { %22 = vperm.xlu0 %63, %v18_v2   ;;  %v14_v5 = vld [vmem:[%s124_s0] sm:$0xff]  ;;  %v15_v6 = vld [vmem:[%s124_s0 + $0x8] sm:$0xff] }
   0x6   :  { %43 = vperm.xlu1 %64, %v35_v3  }
   0x7   :  { %27 = vperm.xlu0 %63, %v19_v4  }
  0x81   :  { %v39_v7 = vpop.permute.xlu1 %38 }
  0x82   :  { %v23_v8 = vpop.permute.xlu0 %22 }
  0x83   :  { %v30_v9 = vmul.f32 %v23_v8, %v14_v5  ;;  %v31_v10 = vmul.f32 %v23_v8, %v15_v6 }
  0x85   :  { %v46_v13 = vadd.f32 %v39_v7, %v30_v9  ;;  %v47_v14 = vadd.f32 %v39_v7, %v31_v10  ;;  %v44_v20 = vpop.permute.xlu1 %43 }
  0x86   :  { %v28_v15 = vpop.permute.xlu0 %27 }
  0x87   :  { %v50_v16 = vmax.f32 %v46_v13, 0.0  ;;  %v51_v17 = vmax.f32 %v47_v14, 0.0  ;;  %v32_v18 = vmul.f32 %v28_v15, %v16_v11  ;;  %v33_v19 = vmul.f32 %v28_v15, %v17_v12 }
  0x89   :  { %54 = vst [vmem:[%s125_s3] sm:$0xff] %v50_v16  ;;  %55 = vst [vmem:[%s125_s3 + $0x8] sm:$0xff] %v51_v17  ;;  %v48_v21 = vadd.f32 %v44_v20, %v32_v18  ;;  %v49_v22 = vadd.f32 %v44_v20, %v33_v19 }
  0x8b   :  { %v52_v23 = vmax.f32 %v48_v21, 0.0  ;;  %v53_v24 = vmax.f32 %v49_v22, 0.0 }
  0x8d   :  { %56 = vst [vmem:[%s125_s3 + $0x10] sm:$0xff] %v52_v23  ;;  %57 = vst [vmem:[%s125_s3 + $0x18] sm:$0xff] %v53_v24 }

// kernel: _lambda_.2
= control target key start
LH: loop header
LB: loop body
LE: loop exit
PB: predicated region body
PF: predicated region fallthrough
CT: control target
= control target key end

     0   :  { %s3004_s12 = smov 0   ;;  %s3006_s13 = smov 0   ;;  %s4168_s0 = inlined_call_operand.vmem [shape: f32[2,1,18,18,4], index: 0, kind: input, shape index: {}]   ;;  %s4169_s1 = inlined_call_operand.vmem [shape: f32[36,8], index: 1, kind: input, shape index: {}]   ;;  %s4170_s2 = inlined_call_operand.vmem [shape: f32[2,8,256], index: 2, kind: output, shape index: {0}]   ;;  %s4171_s3 = inlined_call_operand.vmem [shape: f32[2,1,2,8], index: 3, kind: output, shape index: {1}]  }
   0x1   :  { %s3008_s14 = smov 0  }
   0x2 LB: > { %s26_s15 = sadd.s32 1, %s2970_s13  ;;  %p2577_p0 = scmp.ge.s32.totalorder %s2974_s14, 1  ;;  %s2974_s14 = sphi %s3008_s14, %s14_s14   ;;  %s2970_s13 = sphi %s3006_s13, %s4201_s13   ;;  %s2966_s12 = sphi %s3004_s12, %s4200_s12  }
   0x3   : > { %p28_p1 = scmp.ge.s32.totalorder %s26_s15, 2  ;;  %p162_p2 = scmp.lt.s32.totalorder %s2974_s14, 3 }
   0x5   : > { %s4203_s15 = smov (%p28_p1, %s26_s15), 0  ;;  %p163_p3 = pnand %p2577_p0, %p162_p2 }
   0x7   : > { %166 = sbr.rel (%p163_p3) target bundleno = 940 (0x3ac), region = 28 }
   0xe   : > { %p201_p4 = scmp.lt.s32.totalorder %s2966_s12, 1  ;;  %s2976_s20 = smov 4   ;;  %vm259_vm0 = vcmask 31744   ;;  %vm452_vm1 = vcmask 64544   ;;  %vm645_vm2 = vcmask 97344   ;;  %vm1972_vm3 = vcmask 1043456  }
   0xf   : > { %s2977_s21 = smov 8   ;;  %s2978_s22 = smov 12   ;;  %vm839_vm4 = vcmask 130144   ;;  %vm1032_vm5 = vcmask 162944   ;;  %vm1225_vm6 = vcmask 195744   ;;  %vm1419_vm7 = vcmask 228544  }
  0x10   : > { %s4205_s12 = smov (!%p201_p4, %s2966_s12), 1  ;;  %s2979_s23 = smov 16   ;;  %vm1612_vm8 = vcmask 261344   ;;  %vm1805_vm9 = vcmask 294144   ;;  %vm1875_vm10 = vcmask 293888   ;;  %vm2267_vm11 = vcmask 64512  }
  0x11   : > { %s2919_s16 = smul.u32 432, %s4205_s12  ;;  %s2980_s28 = smov 20   ;;  %vm2438_vm12 = vcmask 1040384   ;;  %vm2440_vm13 = vcmask 58368  }
  0x12   : > { %s2981_s6 = smov 24   ;;  %s2982_s7 = smov 28  }
  0x13   : > { %s3028_s19 = scalar_lea.vmem %s4168_s0, %s2919_s16  ;;  %s2983_s10 = smov 32  }
  0x14   : > { %v3031_v0 = vld [vmem:[%s3028_s19 + $0x19] sm:$0xff]  ;;  %v292_v1 = vld [vmem:[%s3028_s19 + $0x1] sm:$0xff]  ;;  %v293_v3 = vld [vmem:[%s3028_s19 + $0x9] sm:$0xff]  ;;  %s2809_s11 = sshll.u32 %s4205_s12, 4 }
  0x15   : > { %360 = vrot.lane.b32.xlu1 %v3031_v0, %s2976_s20  ;;  %356 = vrot.lane.b32.xlu0 %v292_v1, %s2976_s20  ;;  %v3038_v2 = vld [vmem:[%s3028_s19 + $0x21] sm:$0xff]  ;;  %v3045_v4 = vld [vmem:[%s3028_s19 + $0x39] sm:$0xff]  ;;  %s218_s18 = scalar_lea.vmem %s4170_s2, %s2809_s11 }
  0x16   : > { %v3048_v5 = vld [vmem:[%s3028_s19 + $0x31] sm:$0xff]  ;;  %v3058_v7 = vld [vmem:[%s3028_s19 + $0x49] sm:$0xff]  ;;  %v3068_v9 = vld [vmem:[%s3028_s19 + $0x61] sm:$0xff] }
  0x17   : > { %v3055_v6 = vld [vmem:[%s3028_s19 + $0x51] sm:$0xff]  ;;  %v3065_v8 = vld [vmem:[%s3028_s19 + $0x69] sm:$0xff]  ;;  %v3075_v10 = vld [vmem:[%s3028_s19 + $0x81] sm:$0xff] }
  0x18   : > { %v3078_v11 = vld [vmem:[%s3028_s19 + $0x79] sm:$0xff]  ;;  %v3092_v15 = vld [vmem:[%s3028_s19 + $0x91] sm:$0xff]  ;;  %v228_v17 = vld [vmem:[%s3028_s19 + $0x8] sm:$0xff] }
  0x19   : > { %362 = vrot.lane.b32.xlu1 %v3038_v2, %s2976_s20  ;;  %358 = vrot.lane.b32.xlu0 %v293_v3, %s2976_s20  ;;  %v3085_v12 = vld [vmem:[%s3028_s19 + $0x18] sm:$0xff]  ;;  %v227_v13 = vld [vmem:[%s3028_s19] sm:$0xff]  ;;  %261 = vst.msk [vmem:[#allocation2 + $0x8] sm:$0xff] %vm259_vm0, %v228_v17 }
  0x1a   : > { %v3089_v14 = vld [vmem:[%s3028_s19 + $0x99] sm:$0xff]  ;;  %262 = vst.msk [vmem:[#allocation2 + $0x10] sm:$0xff] %vm259_vm0, %v3085_v12  ;;  %260 = vst.msk [vmem:[#allocation2] sm:$0xff] %vm259_vm0, %v227_v13  ;;  %v3104_v18 = vld [vmem:[%s3028_s19 + $0xb1] sm:$0xff] }
  0x1b   : > { %v3098_v16 = vld [vmem:[%s3028_s19 + $0x20] sm:$0xff]  ;;  %v3108_v19 = vld [vmem:[%s3028_s19 + $0x38] sm:$0xff]  ;;  %v3111_v20 = vld [vmem:[%s3028_s19 + $0x30] sm:$0xff] }
  0x1c   : > { %263 = vst.msk [vmem:[#allocation2 + $0x18] sm:$0xff] %vm259_vm0, %v3098_v16  ;;  %v3118_v21 = vld [vmem:[%s3028_s19 + $0xa9] sm:$0xff]  ;;  %265 = vst.msk [vmem:[#allocation2 + $0x28] sm:$0xff] %vm259_vm0, %v3108_v19  ;;  %v3136_v25 = vld [vmem:[%s3028_s19 + $0x60] sm:$0xff] }
  0x1d   : > { %366 = vrot.lane.b32.xlu1 %v3045_v4, %s2976_s20  ;;  %364 = vrot.lane.b32.xlu0 %v3048_v5, %s2976_s20  ;;  %264 = vst.msk [vmem:[#allocation2 + $0x20] sm:$0xff] %vm259_vm0, %v3111_v20  ;;  %v3125_v22 = vld [vmem:[%s3028_s19 + $0x50] sm:$0xff]  ;;  %v3130_v23 = vld [vmem:[%s3028_s19 + $0x48] sm:$0xff]  ;;  %268 = vst.msk [vmem:[#allocation2 + $0x40] sm:$0xff] %vm259_vm0, %v3136_v25 }
  0x1e   : > { %267 = vst.msk [vmem:[#allocation2 + $0x38] sm:$0xff] %vm259_vm0, %v3125_v22  ;;  %v3133_v24 = vld [vmem:[%s3028_s19 + $0x68] sm:$0xff]  ;;  %266 = vst.msk [vmem:[#allocation2 + $0x30] sm:$0xff] %vm259_vm0, %v3130_v23  ;;  %v3145_v26 = vld [vmem:[%s3028_s19 + $0x80] sm:$0xff] }
  0x1f   : > { %269 = vst.msk [vmem:[#allocation2 + $0x48] sm:$0xff] %vm259_vm0, %v3133_v24  ;;  %v3148_v27 = vld [vmem:[%s3028_s19 + $0x78] sm:$0xff]  ;;  %v3154_v29 = vld [vmem:[%s3028_s19 + $0xc9] sm:$0xff]  ;;  %v3157_v30 = vld [vmem:[%s3028_s19 + $0xc1] sm:$0xff] }
  0x20   : > { %v3151_v28 = vld [vmem:[%s3028_s19 + $0x98] sm:$0xff]  ;;  %271 = vst.msk [vmem:[#allocation2 + $0x58] sm:$0xff] %vm259_vm0, %v3145_v26  ;;  %270 = vst.msk [vmem:[#allocation2 + $0x50] sm:$0xff] %vm259_vm0, %v3148_v27  ;;  %v3166_v31 = vld [vmem:[%s3028_s19 + $0x90] sm:$0xff] }
  0x21   : > { %370 = vrot.lane.b32.xlu1 %v3055_v6, %s2976_s20  ;;  %368 = vrot.lane.b32.xlu0 %v3058_v7, %s2976_s20  ;;  %273 = vst.msk [vmem:[#allocation2 + $0x68] sm:$0xff] %vm259_vm0, %v3151_v28  ;;  %v3169_v32 = vld [vmem:[%s3028_s19 + $0xb0] sm:$0xff]  ;;  %v3172_v33 = vld [vmem:[%s3028_s19 + $0xa8] sm:$0xff]  ;;  %272 = vst.msk [vmem:[#allocation2 + $0x60] sm:$0xff] %vm259_vm0, %v3166_v31 }
  0x22   : > { %275 = vst.msk [vmem:[#allocation2 + $0x78] sm:$0xff] %vm259_vm0, %v3169_v32  ;;  %274 = vst.msk [vmem:[#allocation2 + $0x70] sm:$0xff] %vm259_vm0, %v3172_v33  ;;  %v3185_v34 = vld [vmem:[%s3028_s19 + $0xc8] sm:$0xff]  ;;  %v3188_v35 = vld [vmem:[%s3028_s19 + $0xc0] sm:$0xff] }
  0x23   : > { %277 = vst.msk [vmem:[#allocation2 + $0x88] sm:$0xff] %vm259_vm0, %v3185_v34  ;;  %276 = vst.msk [vmem:[#allocation2 + $0x80] sm:$0xff] %vm259_vm0, %v3188_v35  ;;  %v3195_v36 = vld [vmem:[%s3028_s19 + $0xe0] sm:$0xff]  ;;  %v3198_v37 = vld [vmem:[%s3028_s19 + $0xd8] sm:$0xff] }
  0x24   : > { %v3201_v38 = vld [vmem:[%s3028_s19 + $0xf8] sm:$0xff]  ;;  %279 = vst.msk [vmem:[#allocation2 + $0x98] sm:$0xff] %vm259_vm0, %v3195_v36  ;;  %278 = vst.msk [vmem:[#allocation2 + $0x90] sm:$0xff] %vm259_vm0, %v3198_v37  ;;  %v3210_v39 = vld [vmem:[%s3028_s19 + $0xf0] sm:$0xff] }
  0x25   : > { %374 = vrot.lane.b32.xlu1 %v3065_v8, %s2976_s20  ;;  %372 = vrot.lane.b32.xlu0 %v3068_v9, %s2976_s20  ;;  %281 = vst.msk [vmem:[#allocation2 + $0xa8] sm:$0xff] %vm259_vm0, %v3201_v38  ;;  %v3213_v40 = vld [vmem:[%s3028_s19 + $0x110] sm:$0xff]  ;;  %v3216_v41 = vld [vmem:[%s3028_s19 + $0x108] sm:$0xff]  ;;  %280 = vst.msk [vmem:[#allocation2 + $0xa0] sm:$0xff] %vm259_vm0, %v3210_v39 }
  0x26   : > { %283 = vst.msk [vmem:[#allocation2 + $0xb8] sm:$0xff] %vm259_vm0, %v3213_v40  ;;  %282 = vst.msk [vmem:[#allocation2 + $0xb0] sm:$0xff] %vm259_vm0, %v3216_v41  ;;  %v3229_v42 = vld [vmem:[%s3028_s19 + $0xe1] sm:$0xff]  ;;  %v3232_v43 = vld [vmem:[%s3028_s19 + $0xd9] sm:$0xff] }
  0x27   : > { %4184 = vst [vmem:[#allocation3_spill] sm:$0xff] %v3229_v42  ;;  %v3235_v44 = vld [vmem:[%s3028_s19 + $0x120] sm:$0xff]  ;;  %v3238_v45 = vld [vmem:[%s3028_s19 + $0x128] sm:$0xff]  ;;  %v312_v47 = vld [vmem:[%s3028_s19 + $0xf1] sm:$0xff] }
  0x28   : > { %284 = vst.msk [vmem:[#allocation2 + $0xc0] sm:$0xff] %vm259_vm0, %v3235_v44  ;;  %285 = vst.msk [vmem:[#allocation2 + $0xc8] sm:$0xff] %vm259_vm0, %v3238_v45  ;;  %v313_v46 = vld [vmem:[%s3028_s19 + $0xf9] sm:$0xff]  ;;  %v315_v50 = vld [vmem:[%s3028_s19 + $0x111] sm:$0xff] }
  0x29   : > { %378 = vrot.lane.b32.xlu1 %v3075_v10, %s2976_s20  ;;  %376 = vrot.lane.b32.xlu0 %v3078_v11, %s2976_s20  ;;  %v3251_v48 = vld [vmem:[%s3028_s19 + $0x138] sm:$0xff]  ;;  %v3254_v49 = vld [vmem:[%s3028_s19 + $0x140] sm:$0xff] }
  0x2a   : > { %286 = vst.msk [vmem:[#allocation2 + $0xd0] sm:$0xff] %vm259_vm0, %v3251_v48  ;;  %287 = vst.msk [vmem:[#allocation2 + $0xd8] sm:$0xff] %vm259_vm0, %v3254_v49  ;;  %v314_v51 = vld [vmem:[%s3028_s19 + $0x109] sm:$0xff]  ;;  %v3268_v53 = vld [vmem:[%s3028_s19 + $0x158] sm:$0xff] }
  0x2b   : > { %v3265_v52 = vld [vmem:[%s3028_s19 + $0x150] sm:$0xff]  ;;  %289 = vst.msk [vmem:[#allocation2 + $0xe8] sm:$0xff] %vm259_vm0, %v3268_v53  ;;  %v316_v55 = vld [vmem:[%s3028_s19 + $0x121] sm:$0xff]  ;;  %v318_v59 = vld [vmem:[%s3028_s19 + $0x139] sm:$0xff] }
  0x2c   : > { %288 = vst.msk [vmem:[#allocation2 + $0xe0] sm:$0xff] %vm259_vm0, %v3265_v52  ;;  %v317_v54 = vld [vmem:[%s3028_s19 + $0x129] sm:$0xff]  ;;  %v319_v58 = vld [vmem:[%s3028_s19 + $0x141] sm:$0xff]  ;;  %v321_v60 = vld [vmem:[%s3028_s19 + $0x159] sm:$0xff] }
  0x2d   : > { %382 = vrot.lane.b32.xlu1 %v3089_v14, %s2976_s20  ;;  %380 = vrot.lane.b32.xlu0 %v3092_v15, %s2976_s20  ;;  %v3279_v56 = vld [vmem:[%s3028_s19 + $0x168] sm:$0xff]  ;;  %v3282_v57 = vld [vmem:[%s3028_s19 + $0x170] sm:$0xff] }
  0x2e   : > { %290 = vst.msk [vmem:[#allocation2 + $0xf0] sm:$0xff] %vm259_vm0, %v3279_v56  ;;  %291 = vst.msk [vmem:[#allocation2 + $0xf8] sm:$0xff] %vm259_vm0, %v3282_v57  ;;  %v320_v61 = vld [vmem:[%s3028_s19 + $0x151] sm:$0xff]  ;;  %v322_v63 = vld [vmem:[%s3028_s19 + $0x169] sm:$0xff] }
  0x2f   : > { %v323_v62 = vld [vmem:[%s3028_s19 + $0x171] sm:$0xff]  ;;  %v485_v3 = vld [vmem:[%s3028_s19 + $0x2] sm:$0xff]  ;;  %v3310_v17 = vld [vmem:[%s3028_s19 + $0x1a] sm:$0xff] }
  0x30   : > { %v486_v1 = vld [vmem:[%s3028_s19 + $0xa] sm:$0xff]  ;;  %v3307_v13 = vld [vmem:[%s3028_s19 + $0x22] sm:$0xff] }
  0x31   : > { %386 = vrot.lane.b32.xlu1 %v3104_v18, %s2976_s20  ;;  %384 = vrot.lane.b32.xlu0 %v3118_v21, %s2976_s20 }
  0x35   : > { %390 = vrot.lane.b32.xlu1 %v3154_v29, %s2976_s20  ;;  %388 = vrot.lane.b32.xlu0 %v3157_v30, %s2976_s20 }
  0x39   : > { %394 = vrot.lane.b32.xlu1 %v3229_v42, %s2976_s20  ;;  %392 = vrot.lane.b32.xlu0 %v3232_v43, %s2976_s20 }
  0x3d   : > { %398 = vrot.lane.b32.xlu1 %v313_v46, %s2976_s20  ;;  %396 = vrot.lane.b32.xlu0 %v312_v47, %s2976_s20  ;;  %v3317_v46 = vld [vmem:[%s3028_s19 + $0x3a] sm:$0xff]  ;;  %v3320_v47 = vld [vmem:[%s3028_s19 + $0x32] sm:$0xff] }
  0x41   : > { %402 = vrot.lane.b32.xlu1 %v315_v50, %s2976_s20  ;;  %400 = vrot.lane.b32.xlu0 %v314_v51, %s2976_s20  ;;  %v3327_v50 = vld [vmem:[%s3028_s19 + $0x52] sm:$0xff]  ;;  %v3330_v51 = vld [vmem:[%s3028_s19 + $0x4a] sm:$0xff] }
  0x45   : > { %406 = vrot.lane.b32.xlu1 %v317_v54, %s2976_s20  ;;  %404 = vrot.lane.b32.xlu0 %v316_v55, %s2976_s20  ;;  %v3337_v54 = vld [vmem:[%s3028_s19 + $0x6a] sm:$0xff]  ;;  %v3340_v55 = vld [vmem:[%s3028_s19 + $0x62] sm:$0xff] }
  0x46   : > { %4185 = vst [vmem:[#allocation4_spill] sm:$0xff] %v3337_v54 }
  0x49   : > { %410 = vrot.lane.b32.xlu1 %v319_v58, %s2976_s20  ;;  %408 = vrot.lane.b32.xlu0 %v318_v59, %s2976_s20  ;;  %v3347_v58 = vld [vmem:[%s3028_s19 + $0x82] sm:$0xff]  ;;  %v3350_v59 = vld [vmem:[%s3028_s19 + $0x7a] sm:$0xff] }
  0x4a   : > { %4186 = vst [vmem:[#allocation5_spill] sm:$0xff] %v3347_v58  ;;  %4187 = vst [vmem:[#allocation6_spill] sm:$0xff] %v3350_v59 }
  0x4d   : > { %414 = vrot.lane.b32.xlu1 %v321_v60, %s2976_s20  ;;  %412 = vrot.lane.b32.xlu0 %v320_v61, %s2976_s20  ;;  %v498_v60 = vld [vmem:[%s3028_s19 + $0x9a] sm:$0xff]  ;;  %v497_v61 = vld [vmem:[%s3028_s19 + $0x92] sm:$0xff] }
  0x51   : > { %418 = vrot.lane.b32.xlu1 %v323_v62, %s2976_s20  ;;  %416 = vrot.lane.b32.xlu0 %v322_v63, %s2976_s20  ;;  %v500_v62 = vld [vmem:[%s3028_s19 + $0xb2] sm:$0xff]  ;;  %v499_v63 = vld [vmem:[%s3028_s19 + $0xaa] sm:$0xff] }
  0x55   : > { %551 = vrot.lane.b32.xlu1 %v486_v1, %s2977_s21  ;;  %549 = vrot.lane.b32.xlu0 %v485_v3, %s2977_s21  ;;  %v502_v1 = vld [vmem:[%s3028_s19 + $0xca] sm:$0xff]  ;;  %v501_v3 = vld [vmem:[%s3028_s19 + $0xc2] sm:$0xff] }
  0x59   : > { %555 = vrot.lane.b32.xlu1 %v3307_v13, %s2977_s21  ;;  %553 = vrot.lane.b32.xlu0 %v3310_v17, %s2977_s21 }
  0x5d   : > { %559 = vrot.lane.b32.xlu1 %v3317_v46, %s2977_s21  ;;  %557 = vrot.lane.b32.xlu0 %v3320_v47, %s2977_s21 }
  0x61   : > { %563 = vrot.lane.b32.xlu1 %v3327_v50, %s2977_s21  ;;  %561 = vrot.lane.b32.xlu0 %v3330_v51, %s2977_s21 }
  0x65   : > { %567 = vrot.lane.b32.xlu1 %v3337_v54, %s2977_s21  ;;  %565 = vrot.lane.b32.xlu0 %v3340_v55, %s2977_s21 }
  0x69   : > { %571 = vrot.lane.b32.xlu1 %v3347_v58, %s2977_s21  ;;  %569 = vrot.lane.b32.xlu0 %v3350_v59, %s2977_s21  ;;  %v3369_v58 = vld [vmem:[%s3028_s19 + $0xe2] sm:$0xff] }
  0x6a   : > { %4188 = vst [vmem:[#allocation7_spill] sm:$0xff] %v3369_v58  ;;  %v512_v59 = vld [vmem:[%s3028_s19 + $0x142] sm:$0xff] }
  0x6d   : > { %575 = vrot.lane.b32.xlu1 %v498_v60, %s2977_s21  ;;  %573 = vrot.lane.b32.xlu0 %v497_v61, %s2977_s21  ;;  %v3372_v60 = vld [vmem:[%s3028_s19 + $0xda] sm:$0xff] }
  0x6e   : > { %4189 = vst [vmem:[#allocation8_spill] sm:$0xff] %v3372_v60  ;;  %v3379_v61 = vld [vmem:[%s3028_s19 + $0xfa] sm:$0xff] }
  0x6f   : > { %4190 = vst [vmem:[#allocation9_spill] sm:$0xff] %v3379_v61 }
  0x71   : > { %579 = vrot.lane.b32.xlu1 %v500_v62, %s2977_s21  ;;  %577 = vrot.lane.b32.xlu0 %v499_v63, %s2977_s21  ;;  %v3382_v62 = vld [vmem:[%s3028_s19 + $0xf2] sm:$0xff] }
  0x72   : > { %4191 = vst [vmem:[#allocation10_spill] sm:$0xff] %v3382_v62  ;;  %v508_v63 = vld [vmem:[%s3028_s19 + $0x112] sm:$0xff] }
  0x75   : > { %583 = vrot.lane.b32.xlu1 %v502_v1, %s2977_s21  ;;  %581 = vrot.lane.b32.xlu0 %v501_v3, %s2977_s21  ;;  %v507_v1 = vld [vmem:[%s3028_s19 + $0x10a] sm:$0xff] }
  0x76   : > { %v510_v3 = vld [vmem:[%s3028_s19 + $0x12a] sm:$0xff] }
  0x79   : > { %587 = vrot.lane.b32.xlu1 %v3369_v58, %s2977_s21  ;;  %585 = vrot.lane.b32.xlu0 %v3372_v60, %s2977_s21  ;;  %v509_v58 = vld [vmem:[%s3028_s19 + $0x122] sm:$0xff] }
  0x7d   : > { %591 = vrot.lane.b32.xlu1 %v3379_v61, %s2977_s21  ;;  %589 = vrot.lane.b32.xlu0 %v3382_v62, %s2977_s21  ;;  %v511_v61 = vld [vmem:[%s3028_s19 + $0x13a] sm:$0xff] }
  0x81   : > { %595 = vrot.lane.b32.xlu1 %v508_v63, %s2977_s21  ;;  %593 = vrot.lane.b32.xlu0 %v507_v1, %s2977_s21  ;;  %v514_v63 = vld [vmem:[%s3028_s19 + $0x15a] sm:$0xff]  ;;  %v513_v1 = vld [vmem:[%s3028_s19 + $0x152] sm:$0xff] }
  0x85   : > { %599 = vrot.lane.b32.xlu1 %v510_v3, %s2977_s21  ;;  %597 = vrot.lane.b32.xlu0 %v509_v58, %s2977_s21  ;;  %v516_v58 = vld [vmem:[%s3028_s19 + $0x172] sm:$0xff] }
  0x87   : > { %v361_v62 = vpop.permute.xlu1 %360  ;;  %v357_v42 = vpop.permute.xlu0 %356 }
  0x88   : > { %455 = vst.msk [vmem:[#allocation2 + $0x10] sm:$0xff] %vm452_vm1, %v361_v62  ;;  %453 = vst.msk [vmem:[#allocation2] sm:$0xff] %vm452_vm1, %v357_v42  ;;  %v515_v62 = vld [vmem:[%s3028_s19 + $0x16a] sm:$0xff] }
  0x89   : > { %603 = vrot.lane.b32.xlu1 %v512_v59, %s2977_s21  ;;  %601 = vrot.lane.b32.xlu0 %v511_v61, %s2977_s21 }
  0x8b   : > { %v363_v3 = vpop.permute.xlu1 %362  ;;  %v359_v60 = vpop.permute.xlu0 %358 }
  0x8c   : > { %456 = vst.msk [vmem:[#allocation2 + $0x18] sm:$0xff] %vm452_vm1, %v363_v3  ;;  %454 = vst.msk [vmem:[#allocation2 + $0x8] sm:$0xff] %vm452_vm1, %v359_v60 }
  0x8d   : > { %607 = vrot.lane.b32.xlu1 %v514_v63, %s2977_s21  ;;  %605 = vrot.lane.b32.xlu0 %v513_v1, %s2977_s21 }
  0x8f   : > { %v367_v54 = vpop.permute.xlu1 %366  ;;  %v365_v42 = vpop.permute.xlu0 %364 }
  0x90   : > { %458 = vst.msk [vmem:[#allocation2 + $0x28] sm:$0xff] %vm452_vm1, %v367_v54  ;;  %457 = vst.msk [vmem:[#allocation2 + $0x20] sm:$0xff] %vm452_vm1, %v365_v42 }
  0x91   : > { %611 = vrot.lane.b32.xlu1 %v516_v58, %s2977_s21  ;;  %609 = vrot.lane.b32.xlu0 %v515_v62, %s2977_s21 }
  0x93   : > { %v371_v59 = vpop.permute.xlu1 %370  ;;  %v369_v61 = vpop.permute.xlu0 %368 }
  0x94   : > { %460 = vst.msk [vmem:[#allocation2 + $0x38] sm:$0xff] %vm452_vm1, %v371_v59  ;;  %459 = vst.msk [vmem:[#allocation2 + $0x30] sm:$0xff] %vm452_vm1, %v369_v61 }
  0x95   : > { %745 = vrot.lane.b32.xlu1 %v3098_v16, %s2978_s22  ;;  %743 = vrot.lane.b32.xlu0 %v3085_v12, %s2978_s22 }
  0x97   : > { %v375_v54 = vpop.permute.xlu1 %374  ;;  %v373_v60 = vpop.permute.xlu0 %372 }
  0x98   : > { %462 = vst.msk [vmem:[#allocation2 + $0x48] sm:$0xff] %vm452_vm1, %v375_v54  ;;  %461 = vst.msk [vmem:[#allocation2 + $0x40] sm:$0xff] %vm452_vm1, %v373_v60 }
  0x99   : > { %749 = vrot.lane.b32.xlu1 %v3108_v19, %s2978_s22  ;;  %747 = vrot.lane.b32.xlu0 %v3111_v20, %s2978_s22 }
  0x9b   : > { %v379_v63 = vpop.permute.xlu1 %378  ;;  %v377_v1 = vpop.permute.xlu0 %376 }
  0x9c   : > { %464 = vst.msk [vmem:[#allocation2 + $0x58] sm:$0xff] %vm452_vm1, %v379_v63  ;;  %463 = vst.msk [vmem:[#allocation2 + $0x50] sm:$0xff] %vm452_vm1, %v377_v1 }
  0x9d   : > { %753 = vrot.lane.b32.xlu1 %v3125_v22, %s2978_s22  ;;  %751 = vrot.lane.b32.xlu0 %v3130_v23, %s2978_s22 }
  0x9f   : > { %v383_v12 = vpop.permute.xlu1 %382  ;;  %v381_v16 = vpop.permute.xlu0 %380 }
  0xa0   : > { %466 = vst.msk [vmem:[#allocation2 + $0x68] sm:$0xff] %vm452_vm1, %v383_v12  ;;  %465 = vst.msk [vmem:[#allocation2 + $0x60] sm:$0xff] %vm452_vm1, %v381_v16 }
  0xa1   : > { %757 = vrot.lane.b32.xlu1 %v3133_v24, %s2978_s22  ;;  %755 = vrot.lane.b32.xlu0 %v3136_v25, %s2978_s22 }
  0xa3   : > { %v387_v3 = vpop.permute.xlu1 %386  ;;  %v385_v58 = vpop.permute.xlu0 %384 }
  0xa4   : > { %468 = vst.msk [vmem:[#allocation2 + $0x78] sm:$0xff] %vm452_vm1, %v387_v3  ;;  %467 = vst.msk [vmem:[#allocation2 + $0x70] sm:$0xff] %vm452_vm1, %v385_v58 }
  0xa5   : > { %761 = vrot.lane.b32.xlu1 %v3145_v26, %s2978_s22  ;;  %759 = vrot.lane.b32.xlu0 %v3148_v27, %s2978_s22 }
  0xa7   : > { %v391_v62 = vpop.permute.xlu1 %390  ;;  %v389_v42 = vpop.permute.xlu0 %388 }
  0xa8   : > { %470 = vst.msk [vmem:[#allocation2 + $0x88] sm:$0xff] %vm452_vm1, %v391_v62  ;;  %469 = vst.msk [vmem:[#allocation2 + $0x80] sm:$0xff] %vm452_vm1, %v389_v42 }
  0xa9   : > { %765 = vrot.lane.b32.xlu1 %v3151_v28, %s2978_s22  ;;  %763 = vrot.lane.b32.xlu0 %v3166_v31, %s2978_s22 }
  0xab   : > { %v395_v59 = vpop.permute.xlu1 %394  ;;  %v393_v61 = vpop.permute.xlu0 %392 }
  0xac   : > { %472 = vst.msk [vmem:[#allocation2 + $0x98] sm:$0xff] %vm452_vm1, %v395_v59  ;;  %471 = vst.msk [vmem:[#allocation2 + $0x90] sm:$0xff] %vm452_vm1, %v393_v61 }
  0xad   : > { %769 = vrot.lane.b32.xlu1 %v3169_v32, %s2978_s22  ;;  %767 = vrot.lane.b32.xlu0 %v3172_v33, %s2978_s22 }
  0xaf   : > { %v399_v54 = vpop.permute.xlu1 %398  ;;  %v397_v60 = vpop.permute.xlu0 %396 }
  0xb0   : > { %474 = vst.msk [vmem:[#allocation2 + $0xa8] sm:$0xff] %vm452_vm1, %v399_v54  ;;  %473 = vst.msk [vmem:[#allocation2 + $0xa0] sm:$0xff] %vm452_vm1, %v397_v60 }
  0xb1   : > { %773 = vrot.lane.b32.xlu1 %v3185_v34, %s2978_s22  ;;  %771 = vrot.lane.b32.xlu0 %v3188_v35, %s2978_s22 }
  0xb3   : > { %v403_v63 = vpop.permute.xlu1 %402  ;;  %v401_v1 = vpop.permute.xlu0 %400 }
  0xb4   : > { %476 = vst.msk [vmem:[#allocation2 + $0xb8] sm:$0xff] %vm452_vm1, %v403_v63  ;;  %475 = vst.msk [vmem:[#allocation2 + $0xb0] sm:$0xff] %vm452_vm1, %v401_v1 }
  0xb5   : > { %777 = vrot.lane.b32.xlu1 %v3195_v36, %s2978_s22  ;;  %775 = vrot.lane.b32.xlu0 %v3198_v37, %s2978_s22 }
  0xb7   : > { %v407_v12 = vpop.permute.xlu1 %406  ;;  %v405_v16 = vpop.permute.xlu0 %404 }
  0xb8   : > { %478 = vst.msk [vmem:[#allocation2 + $0xc8] sm:$0xff] %vm452_vm1, %v407_v12  ;;  %477 = vst.msk [vmem:[#allocation2 + $0xc0] sm:$0xff] %vm452_vm1, %v405_v16 }
  0xb9   : > { %781 = vrot.lane.b32.xlu1 %v3201_v38, %s2978_s22  ;;  %779 = vrot.lane.b32.xlu0 %v3210_v39, %s2978_s22 }
  0xbb   : > { %v411_v34 = vpop.permute.xlu1 %410  ;;  %v409_v3 = vpop.permute.xlu0 %408 }
  0xbc   : > { %480 = vst.msk [vmem:[#allocation2 + $0xd8] sm:$0xff] %vm452_vm1, %v411_v34  ;;  %479 = vst.msk [vmem:[#allocation2 + $0xd0] sm:$0xff] %vm452_vm1, %v409_v3 }
  0xbd   : > { %785 = vrot.lane.b32.xlu1 %v3213_v40, %s2978_s22  ;;  %783 = vrot.lane.b32.xlu0 %v3216_v41, %s2978_s22 }
  0xbf   : > { %v415_v36 = vpop.permute.xlu1 %414  ;;  %v413_v37 = vpop.permute.xlu0 %412 }
  0xc0   : > { %482 = vst.msk [vmem:[#allocation2 + $0xe8] sm:$0xff] %vm452_vm1, %v415_v36  ;;  %481 = vst.msk [vmem:[#allocation2 + $0xe0] sm:$0xff] %vm452_vm1, %v413_v37 }
  0xc1   : > { %789 = vrot.lane.b32.xlu1 %v3238_v45, %s2978_s22  ;;  %787 = vrot.lane.b32.xlu0 %v3235_v44, %s2978_s22 }
  0xc3   : > { %v419_v58 = vpop.permute.xlu1 %418  ;;  %v417_v62 = vpop.permute.xlu0 %416 }
  0xc4   : > { %484 = vst.msk [vmem:[#allocation2 + $0xf8] sm:$0xff] %vm452_vm1, %v419_v58  ;;  %483 = vst.msk [vmem:[#allocation2 + $0xf0] sm:$0xff] %vm452_vm1, %v417_v62 }
  0xc5   : > { %793 = vrot.lane.b32.xlu1 %v3254_v49, %s2978_s22  ;;  %791 = vrot.lane.b32.xlu0 %v3251_v48, %s2978_s22  ;;  %v2613_v48 = vld [vmem:[%s3028_s19 + $0x188] sm:$0xff]  ;;  %v2612_v49 = vld [vmem:[%s3028_s19 + $0x180] sm:$0xff] }
  0xc7   : > { %v552_v42 = vpop.permute.xlu1 %551  ;;  %v550_v59 = vpop.permute.xlu0 %549 }
  0xc8   : > { %647 = vst.msk [vmem:[#allocation2 + $0x8] sm:$0xff] %vm645_vm2, %v552_v42  ;;  %646 = vst.msk [vmem:[#allocation2] sm:$0xff] %vm645_vm2, %v550_v59  ;;  %v1872_v59 = vld [vmem:[%s4169_s1 + $0x10] sm:$0xff] }
  0xc9   : > { %797 = vrot.lane.b32.xlu1 %v3268_v53, %s2978_s22  ;;  %795 = vrot.lane.b32.xlu0 %v3265_v52, %s2978_s22 }
  0xcb   : > { %v556_v61 = vpop.permute.xlu1 %555  ;;  %v554_v54 = vpop.permute.xlu0 %553 }
  0xcc   : > { %649 = vst.msk [vmem:[#allocation2 + $0x18] sm:$0xff] %vm645_vm2, %v556_v61  ;;  %648 = vst.msk [vmem:[#allocation2 + $0x10] sm:$0xff] %vm645_vm2, %v554_v54  ;;  %v1873_v61 = vld [vmem:[%s4169_s1 + $0x18] sm:$0xff] }
  0xcd   : > { %801 = vrot.lane.b32.xlu1 %v3282_v57, %s2978_s22  ;;  %799 = vrot.lane.b32.xlu0 %v3279_v56, %s2978_s22 }
  0xcf   : > { %v560_v60 = vpop.permute.xlu1 %559  ;;  %v558_v63 = vpop.permute.xlu0 %557 }
  0xd0   : > { %651 = vst.msk [vmem:[#allocation2 + $0x28] sm:$0xff] %vm645_vm2, %v560_v60  ;;  %650 = vst.msk [vmem:[#allocation2 + $0x20] sm:$0xff] %vm645_vm2, %v558_v63 }
  0xd1   : > { %805 = vrot.lane.b32.xlu1 %v2613_v48, %s2978_s22  ;;  %803 = vrot.lane.b32.xlu0 %v2612_v49, %s2978_s22 }
  0xd3   : > { %v564_v52 = vpop.permute.xlu1 %563  ;;  %v562_v53 = vpop.permute.xlu0 %561 }
  0xd4   : > { %653 = vst.msk [vmem:[#allocation2 + $0x38] sm:$0xff] %vm645_vm2, %v564_v52  ;;  %652 = vst.msk [vmem:[#allocation2 + $0x30] sm:$0xff] %vm645_vm2, %v562_v53 }
  0xd5   : > { %938 = vrot.lane.b32.xlu1 %v3038_v2, %s2979_s23  ;;  %936 = vrot.lane.b32.xlu0 %v3031_v0, %s2979_s23 }
  0xd7   : > { %v568_v56 = vpop.permute.xlu1 %567  ;;  %v566_v57 = vpop.permute.xlu0 %565 }
  0xd8   : > { %655 = vst.msk [vmem:[#allocation2 + $0x48] sm:$0xff] %vm645_vm2, %v568_v56  ;;  %654 = vst.msk [vmem:[#allocation2 + $0x40] sm:$0xff] %vm645_vm2, %v566_v57 }
  0xd9   : > { %942 = vrot.lane.b32.xlu1 %v3045_v4, %s2979_s23  ;;  %940 = vrot.lane.b32.xlu0 %v3048_v5, %s2979_s23 }
  0xdb   : > { %v572_v1 = vpop.permute.xlu1 %571  ;;  %v570_v12 = vpop.permute.xlu0 %569 }
  0xdc   : > { %657 = vst.msk [vmem:[#allocation2 + $0x58] sm:$0xff] %vm645_vm2, %v572_v1  ;;  %656 = vst.msk [vmem:[#allocation2 + $0x50] sm:$0xff] %vm645_vm2, %v570_v12 }
  0xdd   : > { %946 = vrot.lane.b32.xlu1 %v3055_v6, %s2979_s23  ;;  %944 = vrot.lane.b32.xlu0 %v3058_v7, %s2979_s23 }
  0xdf   : > { %v576_v0 = vpop.permute.xlu1 %575  ;;  %v574_v2 = vpop.permute.xlu0 %573 }
  0xe0   : > { %659 = vst.msk [vmem:[#allocation2 + $0x68] sm:$0xff] %vm645_vm2, %v576_v0  ;;  %658 = vst.msk [vmem:[#allocation2 + $0x60] sm:$0xff] %vm645_vm2, %v574_v2  ;;  %v4194_v0 = vld [vmem:[#allocation3_spill] sm:$0xff] }
  0xe1   : > { %950 = vrot.lane.b32.xlu1 %v3065_v8, %s2979_s23  ;;  %948 = vrot.lane.b32.xlu0 %v3068_v9, %s2979_s23  ;;  %v2717_v2 = vld [vmem:[%s3028_s19 + $0x81] sm:$0xff] }
  0xe3   : > { %v580_v16 = vpop.permute.xlu1 %579  ;;  %v578_v34 = vpop.permute.xlu0 %577 }
  0xe4   : > { %661 = vst.msk [vmem:[#allocation2 + $0x78] sm:$0xff] %vm645_vm2, %v580_v16  ;;  %660 = vst.msk [vmem:[#allocation2 + $0x70] sm:$0xff] %vm645_vm2, %v578_v34 }
  0xe5   : > { %954 = vrot.lane.b32.xlu1 %v3075_v10, %s2979_s23  ;;  %952 = vrot.lane.b32.xlu0 %v3078_v11, %s2979_s23 }
  0xe7   : > { %v584_v3 = vpop.permute.xlu1 %583  ;;  %v582_v36 = vpop.permute.xlu0 %581 }
  0xe8   : > { %663 = vst.msk [vmem:[#allocation2 + $0x88] sm:$0xff] %vm645_vm2, %v584_v3  ;;  %662 = vst.msk [vmem:[#allocation2 + $0x80] sm:$0xff] %vm645_vm2, %v582_v36  ;;  %v4196_v36 = vld [vmem:[#allocation7_spill] sm:$0xff] }
  0xe9   : > { %958 = vrot.lane.b32.xlu1 %v3089_v14, %s2979_s23  ;;  %956 = vrot.lane.b32.xlu0 %v3092_v15, %s2979_s23 }
  0xeb   : > { %v588_v37 = vpop.permute.xlu1 %587  ;;  %v586_v58 = vpop.permute.xlu0 %585 }
  0xec   : > { %665 = vst.msk [vmem:[#allocation2 + $0x98] sm:$0xff] %vm645_vm2, %v588_v37  ;;  %664 = vst.msk [vmem:[#allocation2 + $0x90] sm:$0xff] %vm645_vm2, %v586_v58 }
  0xed   : > { %962 = vrot.lane.b32.xlu1 %v3104_v18, %s2979_s23  ;;  %960 = vrot.lane.b32.xlu0 %v3118_v21, %s2979_s23  ;;  %v1870_v18 = vld [vmem:[%s4169_s1] sm:$0xff]  ;;  %v1871_v21 = vld [vmem:[%s4169_s1 + $0x8] sm:$0xff] }
  0xee   : > { %v2905_v42 = vpack.c.bf16 %v1871_v21, %v1870_v18 }
  0xef   : > { %v592_v10 = vpop.permute.xlu1 %591  ;;  %v590_v62 = vpop.permute.xlu0 %589 }
  0xf0   : > { %667 = vst.msk [vmem:[#allocation2 + $0xa8] sm:$0xff] %vm645_vm2, %v592_v10  ;;  %666 = vst.msk [vmem:[#allocation2 + $0xa0] sm:$0xff] %vm645_vm2, %v590_v62  ;;  %2906 = vmatprep.subr.bf16.mxu0 %v2905_v42  ;;  %2913 = vmatprep.subr.bf16.mxu1 %v2905_v42  ;;  %v4197_v10 = vld [vmem:[#allocation5_spill] sm:$0xff] }
  0xf1   : > { %966 = vrot.lane.b32.xlu1 %v3154_v29, %s2979_s23  ;;  %964 = vrot.lane.b32.xlu0 %v3157_v30, %s2979_s23 }
  0xf2   : > { %2908 = vmatpush3.bf16.msra.mxu0 %v2905_v42  ;;  %2916 = vmatpush3.bf16.msra.mxu1 %v2905_v42  ;;  %v2727_v42 = vld [vmem:[%s3028_s19 + $0xf9] sm:$0xff] }
  0xf3   : > { %v596_v14 = vpop.permute.xlu1 %595  ;;  %v594_v15 = vpop.permute.xlu0 %593 }
  0xf4   : > { %669 = vst.msk [vmem:[#allocation2 + $0xb8] sm:$0xff] %vm645_vm2, %v596_v14  ;;  %668 = vst.msk [vmem:[#allocation2 + $0xb0] sm:$0xff] %vm645_vm2, %v594_v15  ;;  %v2726_v15 = vld [vmem:[%s3028_s19 + $0xf1] sm:$0xff] }
  0xf5   : > { %1129 = vrot.lane.b32.xlu1 %v3310_v17, %s2980_s28  ;;  %968 = vrot.lane.b32.xlu0 %v3232_v43, %s2979_s23  ;;  %v2909_v17 = vpack.c.bf16 %v1873_v61, %v1872_v59 }
  0xf7   : > { %v600_v29 = vpop.permute.xlu1 %599  ;;  %v598_v30 = vpop.permute.xlu0 %597  ;;  %2910 = vmatprep.subr.bf16.mxu0 %v2909_v17  ;;  %2914 = vmatprep.subr.bf16.mxu1 %v2909_v17 }
  0xf8   : > { %671 = vst.msk [vmem:[#allocation2 + $0xc8] sm:$0xff] %vm645_vm2, %v600_v29  ;;  %670 = vst.msk [vmem:[#allocation2 + $0xc0] sm:$0xff] %vm645_vm2, %v598_v30  ;;  %2912 = vmatpush3.bf16.msra.mxu0 %v2909_v17  ;;  %2917 = vmatpush3.bf16.msra.mxu1 %v2909_v17  ;;  %v2718_v29 = vld [vmem:[%s3028_s19 + $0x91] sm:$0xff]  ;;  %v2719_v17 = vld [vmem:[%s3028_s19 + $0x99] sm:$0xff] }
  0xf9   : > { %1323 = vrot.lane.b32.xlu1 %v3111_v20, %s2981_s6  ;;  %1131 = vrot.lane.b32.xlu0 %v3307_v13, %s2980_s28  ;;  %v1874_v20 = vld [vmem:[%s4169_s1 + $0x20] sm:$0xf] }
  0xfa   : > { %2855 = vmatprep.subr.msk.mxu0 %vm1972_vm3, %v1874_v20  ;;  %2915 = vmatprep.subr.msk.mxu1 %vm1972_vm3, %v1874_v20 }
  0xfb   : > { %v604_v43 = vpop.permute.xlu1 %603  ;;  %v602_v54 = vpop.permute.xlu0 %601 }
  0xfc   : > { %673 = vst.msk [vmem:[#allocation2 + $0xd8] sm:$0xff] %vm645_vm2, %v604_v43  ;;  %672 = vst.msk [vmem:[#allocation2 + $0xd0] sm:$0xff] %vm645_vm2, %v602_v54  ;;  %2856 = vmatpush3.msk.msra.mxu0 %vm1972_vm3, %v1874_v20  ;;  %2918 = vmatpush3.msk.msra.mxu1 %vm1972_vm3, %v1874_v20  ;;  %v2750_v20 = vld [vmem:[%s3028_s19 + $0x92] sm:$0xff] }
  0xfd   : > { %1516 = vrot.lane.b32.xlu1 %v3048_v5, %s2982_s7  ;;  %1325 = vrot.lane.b32.xlu0 %v3108_v19, %s2981_s6 }
  0xff   : > { %v608_v13 = vpop.permute.xlu1 %607  ;;  %v606_v48 = vpop.permute.xlu0 %605 }
 0x100   : > { %675 = vst.msk [vmem:[#allocation2 + $0xe8] sm:$0xff] %vm645_vm2, %v608_v13  ;;  %674 = vst.msk [vmem:[#allocation2 + $0xe0] sm:$0xff] %vm645_vm2, %v606_v48 }
 0x101   : > { %1709 = vrot.lane.b32.xlu1 %v3320_v47, %s2983_s10  ;;  %1518 = vrot.lane.b32.xlu0 %v3045_v4, %s2982_s7 }
 0x103   : > { %v612_v5 = vpop.permute.xlu1 %611  ;;  %v610_v19 = vpop.permute.xlu0 %609 }
 0x104   : > { %677 = vst.msk [vmem:[#allocation2 + $0xf8] sm:$0xff] %vm645_vm2, %v612_v5  ;;  %676 = vst.msk [vmem:[#allocation2 + $0xf0] sm:$0xff] %vm645_vm2, %v610_v19  ;;  %v4199_v5 = vld [vmem:[#allocation9_spill] sm:$0xff]  ;;  %v2665_v19 = vld [vmem:[%s3028_s19 + $0xfa] sm:$0xff] }
 0x105   : > { %1711 = vrot.lane.b32.xlu1 %v3317_v46, %s2983_s10  ;;  %1133 = vrot.lane.b32.xlu0 %v3320_v47, %s2980_s28 }
 0x107   : > { %v746_v49 = vpop.permute.xlu1 %745  ;;  %v744_v60 = vpop.permute.xlu0 %743 }
 0x108   : > { %841 = vst.msk [vmem:[#allocation2 + $0x8] sm:$0xff] %vm839_vm4, %v746_v49  ;;  %840 = vst.msk [vmem:[#allocation2] sm:$0xff] %vm839_vm4, %v744_v60 }
 0x109   : > { %1327 = vrot.lane.b32.xlu1 %v3130_v23, %s2981_s6  ;;  %1135 = vrot.lane.b32.xlu0 %v3317_v46, %s2980_s28 }
 0x10b   : > { %v750_v4 = vpop.permute.xlu1 %749  ;;  %v748_v63 = vpop.permute.xlu0 %747 }
 0x10c   : > { %843 = vst.msk [vmem:[#allocation2 + $0x18] sm:$0xff] %vm839_vm4, %v750_v4  ;;  %842 = vst.msk [vmem:[#allocation2 + $0x10] sm:$0xff] %vm839_vm4, %v748_v63  ;;  %v2751_v4 = vld [vmem:[%s3028_s19 + $0x9a] sm:$0xff] }
 0x10d   : > { %1520 = vrot.lane.b32.xlu1 %v3058_v7, %s2982_s7  ;;  %1329 = vrot.lane.b32.xlu0 %v3125_v22, %s2981_s6 }
 0x10f   : > { %v754_v47 = vpop.permute.xlu1 %753  ;;  %v752_v52 = vpop.permute.xlu0 %751 }
 0x110   : > { %845 = vst.msk [vmem:[#allocation2 + $0x28] sm:$0xff] %vm839_vm4, %v754_v47  ;;  %844 = vst.msk [vmem:[#allocation2 + $0x20] sm:$0xff] %vm839_vm4, %v752_v52 }
 0x111   : > { %1713 = vrot.lane.b32.xlu1 %v3330_v51, %s2983_s10  ;;  %1522 = vrot.lane.b32.xlu0 %v3055_v6, %s2982_s7 }
 0x113   : > { %v758_v23 = vpop.permute.xlu1 %757  ;;  %v756_v46 = vpop.permute.xlu0 %755 }
 0x114   : > { %847 = vst.msk [vmem:[#allocation2 + $0x38] sm:$0xff] %vm839_vm4, %v758_v23  ;;  %846 = vst.msk [vmem:[#allocation2 + $0x30] sm:$0xff] %vm839_vm4, %v756_v46  ;;  %v2728_v46 = vld [vmem:[%s3028_s19 + $0x109] sm:$0xff] }
 0x115   : > { %1715 = vrot.lane.b32.xlu1 %v3327_v50, %s2983_s10  ;;  %1137 = vrot.lane.b32.xlu0 %v3330_v51, %s2980_s28 }
 0x117   : > { %v762_v7 = vpop.permute.xlu1 %761  ;;  %v760_v22 = vpop.permute.xlu0 %759 }
 0x118   : > { %849 = vst.msk [vmem:[#allocation2 + $0x48] sm:$0xff] %vm839_vm4, %v762_v7  ;;  %848 = vst.msk [vmem:[#allocation2 + $0x40] sm:$0xff] %vm839_vm4, %v760_v22 }
 0x119   : > { %1331 = vrot.lane.b32.xlu1 %v3136_v25, %s2981_s6  ;;  %1139 = vrot.lane.b32.xlu0 %v3327_v50, %s2980_s28 }
 0x11b   : > { %v766_v6 = vpop.permute.xlu1 %765  ;;  %v764_v53 = vpop.permute.xlu0 %763 }
 0x11c   : > { %851 = vst.msk [vmem:[#allocation2 + $0x58] sm:$0xff] %vm839_vm4, %v766_v6  ;;  %850 = vst.msk [vmem:[#allocation2 + $0x50] sm:$0xff] %vm839_vm4, %v764_v53  ;;  %v2729_v6 = vld [vmem:[%s3028_s19 + $0x111] sm:$0xff]  ;;  %v2720_v53 = vld [vmem:[%s3028_s19 + $0xa9] sm:$0xff] }
 0x11d   : > { %1524 = vrot.lane.b32.xlu1 %v3068_v9, %s2982_s7  ;;  %1333 = vrot.lane.b32.xlu0 %v3133_v24, %s2981_s6  ;;  %v4192_v9 = vld [vmem:[#allocation4_spill] sm:$0xff] }
 0x11f   : > { %v770_v51 = vpop.permute.xlu1 %769  ;;  %v768_v56 = vpop.permute.xlu0 %767 }
 0x120   : > { %853 = vst.msk [vmem:[#allocation2 + $0x68] sm:$0xff] %vm839_vm4, %v770_v51  ;;  %852 = vst.msk [vmem:[#allocation2 + $0x60] sm:$0xff] %vm839_vm4, %v768_v56 }
 0x121   : > { %1717 = vrot.lane.b32.xlu1 %v3340_v55, %s2983_s10  ;;  %1526 = vrot.lane.b32.xlu0 %v3065_v8, %s2982_s7 }
 0x123   : > { %v774_v25 = vpop.permute.xlu1 %773  ;;  %v772_v50 = vpop.permute.xlu0 %771 }
 0x124   : > { %855 = vst.msk [vmem:[#allocation2 + $0x78] sm:$0xff] %vm839_vm4, %v774_v25  ;;  %854 = vst.msk [vmem:[#allocation2 + $0x70] sm:$0xff] %vm839_vm4, %v772_v50  ;;  %v2721_v50 = vld [vmem:[%s3028_s19 + $0xb1] sm:$0xff] }
 0x125   : > { %1719 = vrot.lane.b32.xlu1 %v4192_v9, %s2983_s10  ;;  %1141 = vrot.lane.b32.xlu0 %v3340_v55, %s2980_s28 }
 0x127   : > { %v778_v24 = vpop.permute.xlu1 %777  ;;  %v776_v57 = vpop.permute.xlu0 %775 }
 0x128   : > { %857 = vst.msk [vmem:[#allocation2 + $0x88] sm:$0xff] %vm839_vm4, %v778_v24  ;;  %856 = vst.msk [vmem:[#allocation2 + $0x80] sm:$0xff] %vm839_vm4, %v776_v57  ;;  %v2761_v57 = vld [vmem:[%s3028_s19 + $0x112] sm:$0xff] }
 0x129   : > { %1335 = vrot.lane.b32.xlu1 %v3148_v27, %s2981_s6  ;;  %1143 = vrot.lane.b32.xlu0 %v4192_v9, %s2980_s28  ;;  %v4193_v27 = vld [vmem:[#allocation8_spill] sm:$0xff] }
 0x12b   : > { %v782_v8 = vpop.permute.xlu1 %781  ;;  %v780_v1 = vpop.permute.xlu0 %779 }
 0x12c   : > { %859 = vst.msk [vmem:[#allocation2 + $0x98] sm:$0xff] %vm839_vm4, %v782_v8  ;;  %858 = vst.msk [vmem:[#allocation2 + $0x90] sm:$0xff] %vm839_vm4, %v780_v1  ;;  %v2752_v8 = vld [vmem:[%s3028_s19 + $0xaa] sm:$0xff] }
 0x12d   : > { %1528 = vrot.lane.b32.xlu1 %v3078_v11, %s2982_s7  ;;  %1337 = vrot.lane.b32.xlu0 %v3145_v26, %s2981_s6  ;;  %v4195_v11 = vld [vmem:[#allocation6_spill] sm:$0xff] }
 0x12f   : > { %v786_v55 = vpop.permute.xlu1 %785  ;;  %v784_v12 = vpop.permute.xlu0 %783 }
 0x130   : > { %861 = vst.msk [vmem:[#allocation2 + $0xa8] sm:$0xff] %vm839_vm4, %v786_v55  ;;  %860 = vst.msk [vmem:[#allocation2 + $0xa0] sm:$0xff] %vm839_vm4, %v784_v12 }
 0x131   : > { %1161 = vrot.lane.b32.xlu1 %v4193_v27, %s2980_s28  ;;  %970 = vrot.lane.b32.xlu0 %v4194_v0, %s2979_s23 }
 0x133   : > { %v790_v16 = vpop.permute.xlu1 %789  ;;  %v788_v34 = vpop.permute.xlu0 %787 }
 0x134   : > { %863 = vst.msk [vmem:[#allocation2 + $0xb8] sm:$0xff] %vm839_vm4, %v790_v16  ;;  %862 = vst.msk [vmem:[#allocation2 + $0xb0] sm:$0xff] %vm839_vm4, %v788_v34  ;;  %v2753_v16 = vld [vmem:[%s3028_s19 + $0xb2] sm:$0xff] }
 0x135   : > { %1721 = vrot.lane.b32.xlu1 %v4195_v11, %s2983_s10  ;;  %1530 = vrot.lane.b32.xlu0 %v2717_v2, %s2982_s7 }
 0x137   : > { %v794_v26 = vpop.permute.xlu1 %793  ;;  %v792_v3 = vpop.permute.xlu0 %791 }
 0x138   : > { %865 = vst.msk [vmem:[#allocation2 + $0xc8] sm:$0xff] %vm839_vm4, %v794_v26  ;;  %864 = vst.msk [vmem:[#allocation2 + $0xc0] sm:$0xff] %vm839_vm4, %v792_v3 }
 0x139   : > { %1163 = vrot.lane.b32.xlu1 %v4196_v36, %s2980_s28  ;;  %1145 = vrot.lane.b32.xlu0 %v4195_v11, %s2980_s28  ;;  %v2730_v36 = vld [vmem:[%s3028_s19 + $0x121] sm:$0xff] }
 0x13b   : > { %v798_v37 = vpop.permute.xlu1 %797  ;;  %v796_v58 = vpop.permute.xlu0 %795 }
 0x13c   : > { %867 = vst.msk [vmem:[#allocation2 + $0xd8] sm:$0xff] %vm839_vm4, %v798_v37  ;;  %866 = vst.msk [vmem:[#allocation2 + $0xd0] sm:$0xff] %vm839_vm4, %v796_v58 }
 0x13d   : > { %1723 = vrot.lane.b32.xlu1 %v4197_v10, %s2983_s10  ;;  %1355 = vrot.lane.b32.xlu0 %v3210_v39, %s2981_s6 }
 0x13f   : > { %v802_v62 = vpop.permute.xlu1 %801  ;;  %v800_v14 = vpop.permute.xlu0 %799 }
 0x140   : > { %869 = vst.msk [vmem:[#allocation2 + $0xe8] sm:$0xff] %vm839_vm4, %v802_v62  ;;  %868 = vst.msk [vmem:[#allocation2 + $0xe0] sm:$0xff] %vm839_vm4, %v800_v14 }
 0x141   : > { %1339 = vrot.lane.b32.xlu1 %v3166_v31, %s2981_s6  ;;  %1147 = vrot.lane.b32.xlu0 %v4197_v10, %s2980_s28 }
 0x143   : > { %v806_v18 = vpop.permute.xlu1 %805  ;;  %v804_v21 = vpop.permute.xlu0 %803 }
 0x144   : > { %871 = vst.msk [vmem:[#allocation2 + $0xf8] sm:$0xff] %vm839_vm4, %v806_v18  ;;  %870 = vst.msk [vmem:[#allocation2 + $0xf0] sm:$0xff] %vm839_vm4, %v804_v21  ;;  %v2722_v18 = vld [vmem:[%s3028_s19 + $0xc1] sm:$0xff] }
 0x145   : > { %1548 = vrot.lane.b32.xlu1 %v2726_v15, %s2982_s7  ;;  %1357 = vrot.lane.b32.xlu0 %v3201_v38, %s2981_s6 }
 0x147   : > { %v939_v39 = vpop.permute.xlu1 %938  ;;  %v937_v31 = vpop.permute.xlu0 %936 }
 0x148   : > { %1034 = vst.msk [vmem:[#allocation2 + $0x8] sm:$0xff] %vm1032_vm5, %v939_v39  ;;  %1033 = vst.msk [vmem:[#allocation2] sm:$0xff] %vm1032_vm5, %v937_v31  ;;  %v2762_v39 = vld [vmem:[%s3028_s19 + $0x122] sm:$0xff] }
 0x149   : > { %1341 = vrot.lane.b32.xlu1 %v3151_v28, %s2981_s6  ;;  %972 = vrot.lane.b32.xlu0 %v2726_v15, %s2979_s23  ;;  %v4198_v28 = vld [vmem:[#allocation10_spill] sm:$0xff]  ;;  %v2731_v15 = vld [vmem:[%s3028_s19 + $0x129] sm:$0xff] }
 0x14b   : > { %v943_v30 = vpop.permute.xlu1 %942  ;;  %v941_v59 = vpop.permute.xlu0 %940 }
 0x14c   : > { %1036 = vst.msk [vmem:[#allocation2 + $0x18] sm:$0xff] %vm1032_vm5, %v943_v30  ;;  %1035 = vst.msk [vmem:[#allocation2 + $0x10] sm:$0xff] %vm1032_vm5, %v941_v59 }
 0x14d   : > { %1550 = vrot.lane.b32.xlu1 %v2727_v42, %s2982_s7  ;;  %1532 = vrot.lane.b32.xlu0 %v2718_v29, %s2982_s7  ;;  %v2723_v29 = vld [vmem:[%s3028_s19 + $0xc9] sm:$0xff] }
 0x14f   : > { %v947_v38 = vpop.permute.xlu1 %946  ;;  %v945_v61 = vpop.permute.xlu0 %944 }
 0x150   : > { %1038 = vst.msk [vmem:[#allocation2 + $0x28] sm:$0xff] %vm1032_vm5, %v947_v38  ;;  %1037 = vst.msk [vmem:[#allocation2 + $0x20] sm:$0xff] %vm1032_vm5, %v945_v61  ;;  %v2763_v61 = vld [vmem:[%s3028_s19 + $0x12a] sm:$0xff] }
 0x151   : > { %974 = vrot.lane.b32.xlu1 %v2727_v42, %s2979_s23  ;;  %1741 = vrot.lane.b32.xlu0 %v4198_v28, %s2983_s10 }
 0x153   : > { %v951_v43 = vpop.permute.xlu1 %950  ;;  %v949_v54 = vpop.permute.xlu0 %948 }
 0x154   : > { %1040 = vst.msk [vmem:[#allocation2 + $0x38] sm:$0xff] %vm1032_vm5, %v951_v43  ;;  %1039 = vst.msk [vmem:[#allocation2 + $0x30] sm:$0xff] %vm1032_vm5, %v949_v54 }
 0x155   : > { %1534 = vrot.lane.b32.xlu1 %v2719_v17, %s2982_s7  ;;  %1165 = vrot.lane.b32.xlu0 %v4198_v28, %s2980_s28  ;;  %v2754_v28 = vld [vmem:[%s3028_s19 + $0xc2] sm:$0xff] }
 0x157   : > { %v955_v13 = vpop.permute.xlu1 %954  ;;  %v953_v48 = vpop.permute.xlu0 %952 }
 0x158   : > { %1042 = vst.msk [vmem:[#allocation2 + $0x48] sm:$0xff] %vm1032_vm5, %v955_v13  ;;  %1041 = vst.msk [vmem:[#allocation2 + $0x40] sm:$0xff] %vm1032_vm5, %v953_v48  ;;  %v2755_v48 = vld [vmem:[%s3028_s19 + $0xca] sm:$0xff] }
 0x159   : > { %1743 = vrot.lane.b32.xlu1 %v4199_v5, %s2983_s10  ;;  %1725 = vrot.lane.b32.xlu0 %v2750_v20, %s2983_s10  ;;  %v2700_v5 = vld [vmem:[%s3028_s19 + $0x138] sm:$0xff] }
 0x15b   : > { %v959_v49 = vpop.permute.xlu1 %958  ;;  %v957_v60 = vpop.permute.xlu0 %956 }
 0x15c   : > { %1044 = vst.msk [vmem:[#allocation2 + $0x58] sm:$0xff] %vm1032_vm5, %v959_v49  ;;  %1043 = vst.msk [vmem:[#allocation2 + $0x50] sm:$0xff] %vm1032_vm5, %v957_v60  ;;  %v2692_v60 = vld [vmem:[%s3028_s19 + $0xd8] sm:$0xff] }
 0x15d   : > { %1167 = vrot.lane.b32.xlu1 %v2665_v19, %s2980_s28  ;;  %1149 = vrot.lane.b32.xlu0 %v2750_v20, %s2980_s28 }
 0x15f   : > { %v963_v63 = vpop.permute.xlu1 %962  ;;  %v961_v47 = vpop.permute.xlu0 %960 }
 0x160   : > { %1046 = vst.msk [vmem:[#allocation2 + $0x68] sm:$0xff] %vm1032_vm5, %v963_v63  ;;  %1045 = vst.msk [vmem:[#allocation2 + $0x60] sm:$0xff] %vm1032_vm5, %v961_v47  ;;  %v2732_v47 = vld [vmem:[%s3028_s19 + $0x139] sm:$0xff] }
 0x161   : > { %1727 = vrot.lane.b32.xlu1 %v2751_v4, %s2983_s10  ;;  %1359 = vrot.lane.b32.xlu0 %v3216_v41, %s2981_s6 }
 0x163   : > { %v967_v52 = vpop.permute.xlu1 %966  ;;  %v965_v23 = vpop.permute.xlu0 %964 }
 0x164   : > { %1048 = vst.msk [vmem:[#allocation2 + $0x78] sm:$0xff] %vm1032_vm5, %v967_v52  ;;  %1047 = vst.msk [vmem:[#allocation2 + $0x70] sm:$0xff] %vm1032_vm5, %v965_v23  ;;  %v2701_v52 = vld [vmem:[%s3028_s19 + $0x140] sm:$0xff] }
 0x165   : > { %1343 = vrot.lane.b32.xlu1 %v3172_v33, %s2981_s6  ;;  %1151 = vrot.lane.b32.xlu0 %v2751_v4, %s2980_s28 }
 0x167   : > { %v1130_v7 = vpop.permute.xlu1 %1129  ;;  %v969_v22 = vpop.permute.xlu0 %968 }
 0x168   : > { %1226 = vst.msk [vmem:[#allocation2] sm:$0xff] %vm1225_vm6, %v1130_v7 }
 0x169   : > { %1049 = vst.msk [vmem:[#allocation2 + $0x80] sm:$0xff] %vm1032_vm5, %v969_v22  ;;  %1552 = vrot.lane.b32.xlu1 %v2728_v46, %s2982_s7  ;;  %1361 = vrot.lane.b32.xlu0 %v3213_v40, %s2981_s6  ;;  %v2760_v40 = vld [vmem:[%s3028_s19 + $0x10a] sm:$0xff]  ;;  %v2693_v22 = vld [vmem:[%s3028_s19 + $0xe0] sm:$0xff] }
 0x16b   : > { %v1324_v41 = vpop.permute.xlu1 %1323  ;;  %v1132_v33 = vpop.permute.xlu0 %1131 }
 0x16c   : > { %1420 = vst.msk [vmem:[#allocation2] sm:$0xff] %vm1419_vm7, %v1324_v41 }
 0x16d   : > { %1227 = vst.msk [vmem:[#allocation2 + $0x8] sm:$0xff] %vm1225_vm6, %v1132_v33  ;;  %1345 = vrot.lane.b32.xlu1 %v3169_v32, %s2981_s6  ;;  %976 = vrot.lane.b32.xlu0 %v2728_v46, %s2979_s23 }
 0x16f   : > { %v1517_v51 = vpop.permute.xlu1 %1516  ;;  %v1326_v56 = vpop.permute.xlu0 %1325 }
 0x170   : > { %1613 = vst.msk [vmem:[#allocation2] sm:$0xff] %vm1612_vm8, %v1517_v51 }
 0x171   : > { %1421 = vst.msk [vmem:[#allocation2 + $0x8] sm:$0xff] %vm1419_vm7, %v1326_v56  ;;  %1554 = vrot.lane.b32.xlu1 %v2729_v6, %s2982_s7  ;;  %1536 = vrot.lane.b32.xlu0 %v2720_v53, %s2982_s7  ;;  %v2724_v53 = vld [vmem:[%s3028_s19 + $0xd9] sm:$0xff] }
 0x173   : > { %v1710_v32 = vpop.permute.xlu1 %1709  ;;  %v1519_v25 = vpop.permute.xlu0 %1518 }
 0x174   : > { %1806 = vst.msk [vmem:[#allocation2] sm:$0xff] %vm1805_vm9, %v1710_v32  ;;  %v2764_v32 = vld [vmem:[%s3028_s19 + $0x13a] sm:$0xff] }
 0x175   : > { %1614 = vst.msk [vmem:[#allocation2 + $0x8] sm:$0xff] %vm1612_vm8, %v1519_v25  ;;  %978 = vrot.lane.b32.xlu1 %v2729_v6, %s2979_s23  ;;  %1745 = vrot.lane.b32.xlu0 %v2760_v40, %s2983_s10  ;;  %v2733_v6 = vld [vmem:[%s3028_s19 + $0x141] sm:$0xff] }
 0x177   : > { %v1712_v9 = vpop.permute.xlu1 %1711  ;;  %v1134_v24 = vpop.permute.xlu0 %1133 }
 0x178   : > { %1807 = vst.msk [vmem:[#allocation2 + $0x8] sm:$0xff] %vm1805_vm9, %v1712_v9  ;;  %v2725_v9 = vld [vmem:[%s3028_s19 + $0xe1] sm:$0xff] }
 0x179   : > { %1228 = vst.msk [vmem:[#allocation2 + $0x10] sm:$0xff] %vm1225_vm6, %v1134_v24  ;;  %1538 = vrot.lane.b32.xlu1 %v2721_v50, %s2982_s7  ;;  %1169 = vrot.lane.b32.xlu0 %v2760_v40, %s2980_s28 }
 0x17b   : > { %v1328_v1 = vpop.permute.xlu1 %1327  ;;  %v1136_v55 = vpop.permute.xlu0 %1135  ;;  %v1838_v12 = vld [vmem:[#allocation2] sm:$0xff] }
 0x17c   : > { %1422 = vst.msk [vmem:[#allocation2 + $0x10] sm:$0xff] %vm1419_vm7, %v1328_v1  ;;  %2857 = vmatprep.mubr.msk.f32.mxu0 %vm1875_vm10, %v1838_v12  ;;  %v2756_v1 = vld [vmem:[%s3028_s19 + $0xda] sm:$0xff] }
 0x17d   : > { %1229 = vst.msk [vmem:[#allocation2 + $0x18] sm:$0xff] %vm1225_vm6, %v1136_v55  ;;  %1747 = vrot.lane.b32.xlu1 %v2761_v57, %s2983_s10  ;;  %1729 = vrot.lane.b32.xlu0 %v2752_v8, %s2983_s10 }
 0x17f   : > { %v1521_v27 = vpop.permute.xlu1 %1520  ;;  %v1330_v0 = vpop.permute.xlu0 %1329  ;;  %v1839_v2 = vld [vmem:[#allocation2 + $0x8] sm:$0xff] }
 0x180   : > { %1615 = vst.msk [vmem:[#allocation2 + $0x10] sm:$0xff] %vm1612_vm8, %v1521_v27  ;;  %2858 = vmatmul.mubr.msk.f32.vlgmr.msra.gmra.mrb[0].mxu0 %vm1875_vm10, %v1839_v2  ;;  %v2702_v27 = vld [vmem:[%s3028_s19 + $0x150] sm:$0xff] }
 0x181   : > { %1423 = vst.msk [vmem:[#allocation2 + $0x18] sm:$0xff] %vm1419_vm7, %v1330_v0  ;;  %1171 = vrot.lane.b32.xlu1 %v2761_v57, %s2980_s28  ;;  %1153 = vrot.lane.b32.xlu0 %v2752_v8, %s2980_s28  ;;  %v2765_v8 = vld [vmem:[%s3028_s19 + $0x142] sm:$0xff] }
 0x183   : > { %v1714_v34 = vpop.permute.xlu1 %1713  ;;  %v1523_v11 = vpop.permute.xlu0 %1522 }
 0x184   : > { %1808 = vst.msk [vmem:[#allocation2 + $0x10] sm:$0xff] %vm1805_vm9, %v1714_v34  ;;  %v2703_v34 = vld [vmem:[%s3028_s19 + $0x158] sm:$0xff] }
 0x185   : > { %1616 = vst.msk [vmem:[#allocation2 + $0x18] sm:$0xff] %vm1612_vm8, %v1523_v11  ;;  %1731 = vrot.lane.b32.xlu1 %v2753_v16, %s2983_s10  ;;  %1363 = vrot.lane.b32.xlu0 %v3235_v44, %s2981_s6 }
 0x187   : > { %v1716_v26 = vpop.permute.xlu1 %1715  ;;  %v1138_v3 = vpop.permute.xlu0 %1137 }
 0x188   : > { %1809 = vst.msk [vmem:[#allocation2 + $0x18] sm:$0xff] %vm1805_vm9, %v1716_v26 }
 0x189   : > { %1230 = vst.msk [vmem:[#allocation2 + $0x20] sm:$0xff] %vm1225_vm6, %v1138_v3  ;;  %1347 = vrot.lane.b32.xlu1 %v3188_v35, %s2981_s6  ;;  %1155 = vrot.lane.b32.xlu0 %v2753_v16, %s2980_s28  ;;  %v2691_v35 = vld [vmem:[%s3028_s19 + $0xc8] sm:$0xff] }
 0x18a   : > { %v2757_v16 = vld [vmem:[%s3028_s19 + $0xe2] sm:$0xff] }
 0x18b   : > { %v1332_v37 = vpop.permute.xlu1 %1331  ;;  %v1140_v58 = vpop.permute.xlu0 %1139  ;;  %v1840_v10 = vld [vmem:[#allocation2 + $0x10] sm:$0xff] }
 0x18c   : > { %1424 = vst.msk [vmem:[#allocation2 + $0x20] sm:$0xff] %vm1419_vm7, %v1332_v37  ;;  %2860 = vmatprep.mubr.msk.f32.mxu0 %vm1875_vm10, %v1840_v10  ;;  %v2735_v10 = vld [vmem:[%s3028_s19 + $0x159] sm:$0xff] }
 0x18d   : > { %1231 = vst.msk [vmem:[#allocation2 + $0x28] sm:$0xff] %vm1225_vm6, %v1140_v58  ;;  %1556 = vrot.lane.b32.xlu1 %v2730_v36, %s2982_s7  ;;  %1365 = vrot.lane.b32.xlu0 %v3238_v45, %s2981_s6 }
 0x18f   : > { %v1525_v44 = vpop.permute.xlu1 %1524  ;;  %v1334_v62 = vpop.permute.xlu0 %1333  ;;  %v1841_v14 = vld [vmem:[#allocation2 + $0x18] sm:$0xff] }
 0x190   : > { %1617 = vst.msk [vmem:[#allocation2 + $0x20] sm:$0xff] %vm1612_vm8, %v1525_v44  ;;  %2861 = vmatmul.mubr.msk.f32.gmra.mrb[2].mxu0 %vm1875_vm10, %v1841_v14 }
 0x191   : > { %1425 = vst.msk [vmem:[#allocation2 + $0x28] sm:$0xff] %vm1419_vm7, %v1334_v62  ;;  %1349 = vrot.lane.b32.xlu1 %v2691_v35, %s2981_s6  ;;  %980 = vrot.lane.b32.xlu0 %v2730_v36, %s2979_s23  ;;  %v2734_v36 = vld [vmem:[%s3028_s19 + $0x151] sm:$0xff] }
 0x192   : > { %v2766_v35 = vld [vmem:[%s3028_s19 + $0x152] sm:$0xff] }
 0x193   : > { %v1718_v21 = vpop.permute.xlu1 %1717  ;;  %v1527_v45 = vpop.permute.xlu0 %1526 }
 0x194   : > { %1810 = vst.msk [vmem:[#allocation2 + $0x20] sm:$0xff] %vm1805_vm9, %v1718_v21 }
 0x195   : > { %1618 = vst.msk [vmem:[#allocation2 + $0x28] sm:$0xff] %vm1612_vm8, %v1527_v45  ;;  %1558 = vrot.lane.b32.xlu1 %v2731_v15, %s2982_s7  ;;  %1540 = vrot.lane.b32.xlu0 %v2722_v18, %s2982_s7  ;;  %v2767_v45 = vld [vmem:[%s3028_s19 + $0x15a] sm:$0xff] }
 0x197   : > { %v1720_v31 = vpop.permute.xlu1 %1719  ;;  %v1142_v42 = vpop.permute.xlu0 %1141 }
 0x198   : > { %1811 = vst.msk [vmem:[#allocation2 + $0x28] sm:$0xff] %vm1805_vm9, %v1720_v31 }
 0x199   : > { %1232 = vst.msk [vmem:[#allocation2 + $0x30] sm:$0xff] %vm1225_vm6, %v1142_v42  ;;  %982 = vrot.lane.b32.xlu1 %v2731_v15, %s2979_s23  ;;  %1749 = vrot.lane.b32.xlu0 %v2762_v39, %s2983_s10 }
 0x19b   : > { %v1336_v30 = vpop.permute.xlu1 %1335  ;;  %v1144_v59 = vpop.permute.xlu0 %1143  ;;  %v1842_v38 = vld [vmem:[#allocation2 + $0x20] sm:$0xff] }
 0x19c   : > { %1426 = vst.msk [vmem:[#allocation2 + $0x30] sm:$0xff] %vm1419_vm7, %v1336_v30  ;;  %2863 = vmatprep.mubr.msk.f32.mxu0 %vm1875_vm10, %v1842_v38  ;;  %v2705_v30 = vld [vmem:[%s3028_s19 + $0x170] sm:$0xff] }
 0x19d   : > { %1233 = vst.msk [vmem:[#allocation2 + $0x38] sm:$0xff] %vm1225_vm6, %v1144_v59  ;;  %1542 = vrot.lane.b32.xlu1 %v2723_v29, %s2982_s7  ;;  %1173 = vrot.lane.b32.xlu0 %v2762_v39, %s2980_s28  ;;  %v2704_v29 = vld [vmem:[%s3028_s19 + $0x168] sm:$0xff] }
 0x19f   : > { %v1529_v17 = vpop.permute.xlu1 %1528  ;;  %v1338_v43 = vpop.permute.xlu0 %1337  ;;  %v1843_v54 = vld [vmem:[#allocation2 + $0x28] sm:$0xff] }
 0x1a0   : > { %1619 = vst.msk [vmem:[#allocation2 + $0x30] sm:$0xff] %vm1612_vm8, %v1529_v17  ;;  %2864 = vmatmul.mubr.msk.f32.gmra.mrb[4].mxu0 %vm1875_vm10, %v1843_v54  ;;  %v2768_v54 = vld [vmem:[%s3028_s19 + $0x16a] sm:$0xff] }
 0x1a1   : > { %1427 = vst.msk [vmem:[#allocation2 + $0x38] sm:$0xff] %vm1419_vm7, %v1338_v43  ;;  %1751 = vrot.lane.b32.xlu1 %v2763_v61, %s2983_s10  ;;  %1733 = vrot.lane.b32.xlu0 %v2754_v28, %s2983_s10  ;;  %v2737_v43 = vld [vmem:[%s3028_s19 + $0x171] sm:$0xff] }
 0x1a3   : > { %v1162_v20 = vpop.permute.xlu1 %1161  ;;  %v971_v13 = vpop.permute.xlu0 %970 }
 0x1a4   : > { %1242 = vst.msk [vmem:[#allocation2 + $0x80] sm:$0xff] %vm1225_vm6, %v1162_v20 }
 0x1a5   : > { %1050 = vst.msk [vmem:[#allocation2 + $0x88] sm:$0xff] %vm1032_vm5, %v971_v13  ;;  %1175 = vrot.lane.b32.xlu1 %v2763_v61, %s2980_s28  ;;  %1157 = vrot.lane.b32.xlu0 %v2754_v28, %s2980_s28  ;;  %v2736_v61 = vld [vmem:[%s3028_s19 + $0x169] sm:$0xff] }
 0x1a7   : > { %v1722_v19 = vpop.permute.xlu1 %1721  ;;  %v1531_v49 = vpop.permute.xlu0 %1530 }
 0x1a8   : > { %1812 = vst.msk [vmem:[#allocation2 + $0x30] sm:$0xff] %vm1805_vm9, %v1722_v19  ;;  %v2769_v19 = vld [vmem:[%s3028_s19 + $0x172] sm:$0xff] }
 0x1a9   : > { %1620 = vst.msk [vmem:[#allocation2 + $0x38] sm:$0xff] %vm1612_vm8, %v1531_v49  ;;  %1735 = vrot.lane.b32.xlu1 %v2755_v48, %s2983_s10  ;;  %1367 = vrot.lane.b32.xlu0 %v2700_v5, %s2981_s6 }
 0x1ab   : > { %v1164_v4 = vpop.permute.xlu1 %1163  ;;  %v1146_v63 = vpop.permute.xlu0 %1145 }
 0x1ac   : > { %1243 = vst.msk [vmem:[#allocation2 + $0x88] sm:$0xff] %vm1225_vm6, %v1164_v4  ;;  %1234 = vst.msk [vmem:[#allocation2 + $0x40] sm:$0xff] %vm1225_vm6, %v1146_v63  ;;  %v2706_v63 = vld [vmem:[%s3028_s19 + $0x180] sm:$0xff] }
 0x1ad   : > { %1351 = vrot.lane.b32.xlu1 %v2692_v60, %s2981_s6  ;;  %1159 = vrot.lane.b32.xlu0 %v2755_v48, %s2980_s28 }
 0x1af   : > { %v1724_v23 = vpop.permute.xlu1 %1723  ;;  %v1356_v46 = vpop.permute.xlu0 %1355  ;;  %v1844_v7 = vld [vmem:[#allocation2 + $0x30] sm:$0xff] }
 0x1b0   : > { %1813 = vst.msk [vmem:[#allocation2 + $0x38] sm:$0xff] %vm1805_vm9, %v1724_v23  ;;  %2866 = vmatprep.mubr.msk.f32.mxu0 %vm1875_vm10, %v1844_v7 }
 0x1b1   : > { %1436 = vst.msk [vmem:[#allocation2 + $0x80] sm:$0xff] %vm1419_vm7, %v1356_v46  ;;  %1560 = vrot.lane.b32.xlu1 %v2732_v47, %s2982_s7  ;;  %1369 = vrot.lane.b32.xlu0 %v2701_v52, %s2981_s6  ;;  %v2738_v46 = vld [vmem:[%s3028_s19 + $0x181] sm:$0xff] }
 0x1b3   : > { %v1340_v41 = vpop.permute.xlu1 %1339  ;;  %v1148_v33 = vpop.permute.xlu0 %1147 }
 0x1b4   : > { %1428 = vst.msk [vmem:[#allocation2 + $0x40] sm:$0xff] %vm1419_vm7, %v1340_v41 }
 0x1b5   : > { %1235 = vst.msk [vmem:[#allocation2 + $0x48] sm:$0xff] %vm1225_vm6, %v1148_v33  ;;  %1353 = vrot.lane.b32.xlu1 %v2693_v22, %s2981_s6  ;;  %984 = vrot.lane.b32.xlu0 %v2732_v47, %s2979_s23  ;;  %v2707_v47 = vld [vmem:[%s3028_s19 + $0x188] sm:$0xff] }
 0x1b7   : > { %v1549_v51 = vpop.permute.xlu1 %1548  ;;  %v1358_v56 = vpop.permute.xlu0 %1357  ;;  %v1845_v40 = vld [vmem:[#allocation2 + $0x38] sm:$0xff] }
 0x1b8   : > { %1629 = vst.msk [vmem:[#allocation2 + $0x80] sm:$0xff] %vm1612_vm8, %v1549_v51  ;;  %2867 = vmatmul.mubr.msk.f32.gmra.mrb[6].mxu0 %vm1875_vm10, %v1845_v40 }
 0x1b9   : > { %1437 = vst.msk [vmem:[#allocation2 + $0x88] sm:$0xff] %vm1419_vm7, %v1358_v56  ;;  %1562 = vrot.lane.b32.xlu1 %v2733_v6, %s2982_s7  ;;  %1544 = vrot.lane.b32.xlu0 %v2724_v53, %s2982_s7  ;;  %v2770_v53 = vld [vmem:[%s3028_s19 + $0x182] sm:$0xff] }
 0x1bb   : > { %v1342_v25 = vpop.permute.xlu1 %1341  ;;  %v973_v50 = vpop.permute.xlu0 %972 }
 0x1bc   : > { %1429 = vst.msk [vmem:[#allocation2 + $0x48] sm:$0xff] %vm1419_vm7, %v1342_v25 }
 0x1bd   : > { %1051 = vst.msk [vmem:[#allocation2 + $0x90] sm:$0xff] %vm1032_vm5, %v973_v50  ;;  %986 = vrot.lane.b32.xlu1 %v2733_v6, %s2979_s23  ;;  %1753 = vrot.lane.b32.xlu0 %v2764_v32, %s2983_s10  ;;  %v2739_v6 = vld [vmem:[%s3028_s19 + $0x189] sm:$0xff] }
 0x1be   : > { %v2771_v50 = vld [vmem:[%s3028_s19 + $0x18a] sm:$0xff] }
 0x1bf   : > { %v1551_v24 = vpop.permute.xlu1 %1550  ;;  %v1533_v57 = vpop.permute.xlu0 %1532 }
 0x1c0   : > { %1630 = vst.msk [vmem:[#allocation2 + $0x88] sm:$0xff] %vm1612_vm8, %v1551_v24  ;;  %1621 = vst.msk [vmem:[#allocation2 + $0x40] sm:$0xff] %vm1612_vm8, %v1533_v57  ;;  %v2708_v57 = vld [vmem:[%s3028_s19 + $0x198] sm:$0xff] }
 0x1c1   : > { %1546 = vrot.lane.b32.xlu1 %v2725_v9, %s2982_s7  ;;  %1177 = vrot.lane.b32.xlu0 %v2764_v32, %s2980_s28 }
 0x1c3   : > { %v975_v55 = vpop.permute.xlu1 %974  ;;  %v1742_v12 = vpop.permute.xlu0 %1741 }
 0x1c4   : > { %1052 = vst.msk [vmem:[#allocation2 + $0x98] sm:$0xff] %vm1032_vm5, %v975_v55 }
 0x1c5   : > { %1822 = vst.msk [vmem:[#allocation2 + $0x80] sm:$0xff] %vm1805_vm9, %v1742_v12  ;;  %1755 = vrot.lane.b32.xlu1 %v2765_v8, %s2983_s10  ;;  %1737 = vrot.lane.b32.xlu0 %v2756_v1, %s2983_s10  ;;  %v2740_v12 = vld [vmem:[%s3028_s19 + $0x199] sm:$0xff] }
 0x1c7   : > { %v1535_v0 = vpop.permute.xlu1 %1534  ;;  %v1166_v2 = vpop.permute.xlu0 %1165 }
 0x1c8   : > { %1622 = vst.msk [vmem:[#allocation2 + $0x48] sm:$0xff] %vm1612_vm8, %v1535_v0 }
 0x1c9   : > { %1244 = vst.msk [vmem:[#allocation2 + $0x90] sm:$0xff] %vm1225_vm6, %v1166_v2  ;;  %1179 = vrot.lane.b32.xlu0 %v2765_v8, %s2980_s28  ;;  %1371 = vrot.lane.b32.xlu1 %v2702_v27, %s2981_s6  ;;  %v2709_v8 = vld [vmem:[%s3028_s19 + $0x1a0] sm:$0xff] }
 0x1ca   : > { %v2741_v27 = vld [vmem:[%s3028_s19 + $0x1a1] sm:$0xff] }
 0x1cb   : > { %v1744_v11 = vpop.permute.xlu1 %1743  ;;  %v1726_v26 = vpop.permute.xlu0 %1725 }
 0x1cc   : > { %v1854_v3 = vld [vmem:[#allocation2 + $0x80] sm:$0xff]  ;;  %1823 = vst.msk [vmem:[#allocation2 + $0x88] sm:$0xff] %vm1805_vm9, %v1744_v11  ;;  %1814 = vst.msk [vmem:[#allocation2 + $0x40] sm:$0xff] %vm1805_vm9, %v1726_v26 }
 0x1cd   : > { %2881 = vmatprep.mubr.msk.f32.mxu1 %vm1875_vm10, %v1854_v3  ;;  %1739 = vrot.lane.b32.xlu0 %v2757_v16, %s2983_s10  ;;  %v2772_v16 = vld [vmem:[%s3028_s19 + $0x19a] sm:$0xff] }
 0x1ce   : > { %1373 = vrot.lane.b32.xlu1 %v2703_v34, %s2981_s6  ;;  %v2773_v34 = vld [vmem:[%s3028_s19 + $0x1a2] sm:$0xff]  ;;  %s2581_s19 = sshll.u32 %s4205_s12, 1 }
 0x1cf   : > { %v1168_v37 = vpop.permute.xlu1 %1167  ;;  %v1150_v58 = vpop.permute.xlu0 %1149  ;;  %s226_s22 = scalar_lea.vmem %s4171_s3, %s2581_s19 }
 0x1d0   : > { %1245 = vst.msk [vmem:[#allocation2 + $0x98] sm:$0xff] %vm1225_vm6, %v1168_v37  ;;  %1236 = vst.msk [vmem:[#allocation2 + $0x50] sm:$0xff] %vm1225_vm6, %v1150_v58 }
 0x1d1   : > { %1564 = vrot.lane.b32.xlu0 %v2734_v36, %s2982_s7 }
 0x1d2   : > { %988 = vrot.lane.b32.xlu1 %v2734_v36, %s2979_s23 }
 0x1d3   : > { %v1728_v44 = vpop.permute.xlu1 %1727  ;;  %v1360_v62 = vpop.permute.xlu0 %1359  ;;  %v1846_v14 = vld [vmem:[#allocation2 + $0x40] sm:$0xff]  ;;  %v1855_v15 = vld [vmem:[#allocation2 + $0x88] sm:$0xff] }
 0x1d4   : > { %1815 = vst.msk [vmem:[#allocation2 + $0x48] sm:$0xff] %vm1805_vm9, %v1728_v44  ;;  %2869 = vmatprep.mubr.msk.f32.mxu0 %vm1875_vm10, %v1846_v14  ;;  %2882 = vmatmul.mubr.msk.f32.vlgmr.msra.gmra.mrb[0].mxu1 %vm1875_vm10, %v1855_v15 }
 0x1d5   : > { %1438 = vst.msk [vmem:[#allocation2 + $0x90] sm:$0xff] %vm1419_vm7, %v1360_v62  ;;  %1566 = vrot.lane.b32.xlu0 %v2735_v10, %s2982_s7 }
 0x1d6   : > { %1757 = vrot.lane.b32.xlu1 %v2766_v35, %s2983_s10 }
 0x1d7   : > { %v1344_v18 = vpop.permute.xlu1 %1343  ;;  %v1152_v21 = vpop.permute.xlu0 %1151 }
 0x1d8   : > { %1430 = vst.msk [vmem:[#allocation2 + $0x50] sm:$0xff] %vm1419_vm7, %v1344_v18 }
 0x1d9   : > { %1237 = vst.msk [vmem:[#allocation2 + $0x58] sm:$0xff] %vm1225_vm6, %v1152_v21  ;;  %990 = vrot.lane.b32.xlu0 %v2735_v10, %s2979_s23 }
 0x1da   : > { %1181 = vrot.lane.b32.xlu1 %v2766_v35, %s2980_s28 }
 0x1db   : > { %v1553_v39 = vpop.permute.xlu1 %1552  ;;  %v1362_v31 = vpop.permute.xlu0 %1361  ;;  %v1847_v42 = vld [vmem:[#allocation2 + $0x48] sm:$0xff] }
 0x1dc   : > { %1631 = vst.msk [vmem:[#allocation2 + $0x90] sm:$0xff] %vm1612_vm8, %v1553_v39  ;;  %2870 = vmatmul.mubr.msk.f32.gmra.mrb[8].mxu0 %vm1875_vm10, %v1847_v42 }
 0x1dd   : > { %1439 = vst.msk [vmem:[#allocation2 + $0x98] sm:$0xff] %vm1419_vm7, %v1362_v31  ;;  %1759 = vrot.lane.b32.xlu0 %v2767_v45, %s2983_s10 }
 0x1de   : > { %1183 = vrot.lane.b32.xlu1 %v2767_v45, %s2980_s28 }
 0x1df   : > { %v1346_v59 = vpop.permute.xlu1 %1345  ;;  %v977_v38 = vpop.permute.xlu0 %976 }
 0x1e0   : > { %1431 = vst.msk [vmem:[#allocation2 + $0x58] sm:$0xff] %vm1419_vm7, %v1346_v59 }
 0x1e1   : > { %1053 = vst.msk [vmem:[#allocation2 + $0xa0] sm:$0xff] %vm1032_vm5, %v977_v38  ;;  %1375 = vrot.lane.b32.xlu0 %v2704_v29, %s2981_s6 }
 0x1e2   : > { %1377 = vrot.lane.b32.xlu1 %v2705_v30, %s2981_s6 }
 0x1e3   : > { %v1555_v28 = vpop.permute.xlu1 %1554  ;;  %v1537_v17 = vpop.permute.xlu0 %1536 }
 0x1e4   : > { %1632 = vst.msk [vmem:[#allocation2 + $0x98] sm:$0xff] %vm1612_vm8, %v1555_v28  ;;  %1623 = vst.msk [vmem:[#allocation2 + $0x50] sm:$0xff] %vm1612_vm8, %v1537_v17 }
 0x1e5   : > { %1568 = vrot.lane.b32.xlu0 %v2736_v61, %s2982_s7 }
 0x1e6   : > { %992 = vrot.lane.b32.xlu1 %v2736_v61, %s2979_s23 }
 0x1e7   : > { %v979_v20 = vpop.permute.xlu1 %978  ;;  %v1746_v13 = vpop.permute.xlu0 %1745 }
 0x1e8   : > { %1054 = vst.msk [vmem:[#allocation2 + $0xa8] sm:$0xff] %vm1032_vm5, %v979_v20 }
 0x1e9   : > { %1824 = vst.msk [vmem:[#allocation2 + $0x90] sm:$0xff] %vm1805_vm9, %v1746_v13  ;;  %1570 = vrot.lane.b32.xlu0 %v2737_v43, %s2982_s7 }
 0x1ea   : > { %1761 = vrot.lane.b32.xlu1 %v2768_v54, %s2983_s10 }
 0x1eb   : > { %v1539_v48 = vpop.permute.xlu1 %1538  ;;  %v1170_v5 = vpop.permute.xlu0 %1169 }
 0x1ec   : > { %1624 = vst.msk [vmem:[#allocation2 + $0x58] sm:$0xff] %vm1612_vm8, %v1539_v48 }
 0x1ed   : > { %1246 = vst.msk [vmem:[#allocation2 + $0xa0] sm:$0xff] %vm1225_vm6, %v1170_v5  ;;  %994 = vrot.lane.b32.xlu0 %v2737_v43, %s2979_s23 }
 0x1ee   : > { %1185 = vrot.lane.b32.xlu1 %v2768_v54, %s2980_s28 }
 0x1ef   : > { %v1748_v49 = vpop.permute.xlu1 %1747  ;;  %v1730_v60 = vpop.permute.xlu0 %1729 }
 0x1f0   : > { %v1856_v4 = vld [vmem:[#allocation2 + $0x90] sm:$0xff]  ;;  %1825 = vst.msk [vmem:[#allocation2 + $0x98] sm:$0xff] %vm1805_vm9, %v1748_v49  ;;  %1816 = vst.msk [vmem:[#allocation2 + $0x50] sm:$0xff] %vm1805_vm9, %v1730_v60 }
 0x1f1   : > { %2884 = vmatprep.mubr.msk.f32.mxu1 %vm1875_vm10, %v1856_v4  ;;  %1763 = vrot.lane.b32.xlu0 %v2769_v19, %s2983_s10 }
 0x1f2   : > { %1187 = vrot.lane.b32.xlu1 %v2769_v19, %s2980_s28 }
 0x1f3   : > { %v1172_v52 = vpop.permute.xlu1 %1171  ;;  %v1154_v23 = vpop.permute.xlu0 %1153 }
 0x1f4   : > { %1247 = vst.msk [vmem:[#allocation2 + $0xa8] sm:$0xff] %vm1225_vm6, %v1172_v52  ;;  %1238 = vst.msk [vmem:[#allocation2 + $0x60] sm:$0xff] %vm1225_vm6, %v1154_v23 }
 0x1f5   : > { %1379 = vrot.lane.b32.xlu0 %v2706_v63, %s2981_s6 }
 0x1f6   : > { %1381 = vrot.lane.b32.xlu1 %v2707_v47, %s2981_s6 }
 0x1f7   : > { %v1732_v7 = vpop.permute.xlu1 %1731  ;;  %v1364_v22 = vpop.permute.xlu0 %1363  ;;  %v1848_v41 = vld [vmem:[#allocation2 + $0x50] sm:$0xff]  ;;  %v1857_v33 = vld [vmem:[#allocation2 + $0x98] sm:$0xff] }
 0x1f8   : > { %1817 = vst.msk [vmem:[#allocation2 + $0x58] sm:$0xff] %vm1805_vm9, %v1732_v7  ;;  %2872 = vmatprep.mubr.msk.f32.mxu0 %vm1875_vm10, %v1848_v41  ;;  %2885 = vmatmul.mubr.msk.f32.gmra.mrb[2].mxu1 %vm1875_vm10, %v1857_v33 }
 0x1f9   : > { %1440 = vst.msk [vmem:[#allocation2 + $0xa0] sm:$0xff] %vm1419_vm7, %v1364_v22  ;;  %1572 = vrot.lane.b32.xlu0 %v2738_v46, %s2982_s7 }
 0x1fa   : > { %996 = vrot.lane.b32.xlu1 %v2738_v46, %s2979_s23 }
 0x1fb   : > { %v1348_v51 = vpop.permute.xlu1 %1347  ;;  %v1156_v56 = vpop.permute.xlu0 %1155 }
 0x1fc   : > { %1432 = vst.msk [vmem:[#allocation2 + $0x60] sm:$0xff] %vm1419_vm7, %v1348_v51 }
 0x1fd   : > { %1239 = vst.msk [vmem:[#allocation2 + $0x68] sm:$0xff] %vm1225_vm6, %v1156_v56  ;;  %1574 = vrot.lane.b32.xlu0 %v2739_v6, %s2982_s7 }
 0x1fe   : > { %1765 = vrot.lane.b32.xlu1 %v2770_v53, %s2983_s10 }
 0x1ff   : > { %v1557_v40 = vpop.permute.xlu1 %1556  ;;  %v1366_v32 = vpop.permute.xlu0 %1365  ;;  %v1849_v25 = vld [vmem:[#allocation2 + $0x58] sm:$0xff] }
 0x200   : > { %1633 = vst.msk [vmem:[#allocation2 + $0xa0] sm:$0xff] %vm1612_vm8, %v1557_v40  ;;  %2873 = vmatmul.mubr.msk.f32.gmra.mrb[10].mxu0 %vm1875_vm10, %v1849_v25 }
 0x201   : > { %1441 = vst.msk [vmem:[#allocation2 + $0xa8] sm:$0xff] %vm1419_vm7, %v1366_v32  ;;  %998 = vrot.lane.b32.xlu0 %v2739_v6, %s2979_s23 }
 0x202   : > { %1189 = vrot.lane.b32.xlu1 %v2770_v53, %s2980_s28 }
 0x203   : > { %v1350_v9 = vpop.permute.xlu1 %1349  ;;  %v981_v24 = vpop.permute.xlu0 %980 }
 0x204   : > { %1433 = vst.msk [vmem:[#allocation2 + $0x68] sm:$0xff] %vm1419_vm7, %v1350_v9 }
 0x205   : > { %1055 = vst.msk [vmem:[#allocation2 + $0xb0] sm:$0xff] %vm1032_vm5, %v981_v24  ;;  %1767 = vrot.lane.b32.xlu0 %v2771_v50, %s2983_s10 }
 0x206   : > { %1191 = vrot.lane.b32.xlu1 %v2771_v50, %s2980_s28 }
 0x207   : > { %v1559_v1 = vpop.permute.xlu1 %1558  ;;  %v1541_v55 = vpop.permute.xlu0 %1540 }
 0x208   : > { %1634 = vst.msk [vmem:[#allocation2 + $0xa8] sm:$0xff] %vm1612_vm8, %v1559_v1  ;;  %1625 = vst.msk [vmem:[#allocation2 + $0x60] sm:$0xff] %vm1612_vm8, %v1541_v55 }
 0x209   : > { %1383 = vrot.lane.b32.xlu0 %v2708_v57, %s2981_s6 }
 0x20a   : > { %1385 = vrot.lane.b32.xlu1 %v2709_v8, %s2981_s6 }
 0x20b   : > { %v983_v0 = vpop.permute.xlu1 %982  ;;  %v1750_v2 = vpop.permute.xlu0 %1749 }
 0x20c   : > { %1056 = vst.msk [vmem:[#allocation2 + $0xb8] sm:$0xff] %vm1032_vm5, %v983_v0 }
 0x20d   : > { %1826 = vst.msk [vmem:[#allocation2 + $0xa0] sm:$0xff] %vm1805_vm9, %v1750_v2  ;;  %1576 = vrot.lane.b32.xlu0 %v2740_v12, %s2982_s7 }
 0x20e   : > { %1578 = vrot.lane.b32.xlu1 %v2741_v27, %s2982_s7 }
 0x20f   : > { %v1543_v11 = vpop.permute.xlu1 %1542  ;;  %v1174_v26 = vpop.permute.xlu0 %1173 }
 0x210   : > { %1626 = vst.msk [vmem:[#allocation2 + $0x68] sm:$0xff] %vm1612_vm8, %v1543_v11 }
 0x211   : > { %1248 = vst.msk [vmem:[#allocation2 + $0xb0] sm:$0xff] %vm1225_vm6, %v1174_v26  ;;  %1769 = vrot.lane.b32.xlu0 %v2772_v16, %s2983_s10 }
 0x212   : > { %1771 = vrot.lane.b32.xlu1 %v2773_v34, %s2983_s10 }
 0x213   : > { %v1752_v3 = vpop.permute.xlu1 %1751  ;;  %v1734_v36 = vpop.permute.xlu0 %1733 }
 0x214   : > { %v1858_v37 = vld [vmem:[#allocation2 + $0xa0] sm:$0xff]  ;;  %1827 = vst.msk [vmem:[#allocation2 + $0xa8] sm:$0xff] %vm1805_vm9, %v1752_v3  ;;  %1818 = vst.msk [vmem:[#allocation2 + $0x60] sm:$0xff] %vm1805_vm9, %v1734_v36 }
 0x215   : > { %2887 = vmatprep.mubr.msk.f32.mxu1 %vm1875_vm10, %v1858_v37 }
 0x217   : > { %v1176_v58 = vpop.permute.xlu1 %1175  ;;  %v1158_v10 = vpop.permute.xlu0 %1157 }
 0x218   : > { %1249 = vst.msk [vmem:[#allocation2 + $0xb8] sm:$0xff] %vm1225_vm6, %v1176_v58  ;;  %1240 = vst.msk [vmem:[#allocation2 + $0x70] sm:$0xff] %vm1225_vm6, %v1158_v10 }
 0x21b   : > { %v1736_v35 = vpop.permute.xlu1 %1735  ;;  %v1368_v44 = vpop.permute.xlu0 %1367  ;;  %v1850_v62 = vld [vmem:[#allocation2 + $0x60] sm:$0xff]  ;;  %v1859_v14 = vld [vmem:[#allocation2 + $0xa8] sm:$0xff] }
 0x21c   : > { %1819 = vst.msk [vmem:[#allocation2 + $0x68] sm:$0xff] %vm1805_vm9, %v1736_v35  ;;  %2875 = vmatprep.mubr.msk.f32.mxu0 %vm1875_vm10, %v1850_v62  ;;  %2888 = vmatmul.mubr.msk.f32.gmra.mrb[4].mxu1 %vm1875_vm10, %v1859_v14 }
 0x21d   : > { %1442 = vst.msk [vmem:[#allocation2 + $0xb0] sm:$0xff] %vm1419_vm7, %v1368_v44 }
 0x21f   : > { %v1352_v15 = vpop.permute.xlu1 %1351  ;;  %v1160_v18 = vpop.permute.xlu0 %1159 }
 0x220   : > { %1434 = vst.msk [vmem:[#allocation2 + $0x70] sm:$0xff] %vm1419_vm7, %v1352_v15 }
 0x221   : > { %1241 = vst.msk [vmem:[#allocation2 + $0x78] sm:$0xff] %vm1225_vm6, %v1160_v18 }
 0x223   : > { %v1561_v21 = vpop.permute.xlu1 %1560  ;;  %v1370_v45 = vpop.permute.xlu0 %1369  ;;  %v1851_v39 = vld [vmem:[#allocation2 + $0x68] sm:$0xff] }
 0x224   : > { %1635 = vst.msk [vmem:[#allocation2 + $0xb0] sm:$0xff] %vm1612_vm8, %v1561_v21  ;;  %2876 = vmatmul.mubr.msk.f32.gmra.mrb[12].mxu0 %vm1875_vm10, %v1851_v39 }
 0x225   : > { %1443 = vst.msk [vmem:[#allocation2 + $0xb8] sm:$0xff] %vm1419_vm7, %v1370_v45 }
 0x227   : > { %v1354_v31 = vpop.permute.xlu1 %1353  ;;  %v985_v42 = vpop.permute.xlu0 %984 }
 0x228   : > { %1435 = vst.msk [vmem:[#allocation2 + $0x78] sm:$0xff] %vm1419_vm7, %v1354_v31 }
 0x229   : > { %1057 = vst.msk [vmem:[#allocation2 + $0xc0] sm:$0xff] %vm1032_vm5, %v985_v42 }
 0x22b   : > { %v1563_v29 = vpop.permute.xlu1 %1562  ;;  %v1545_v30 = vpop.permute.xlu0 %1544 }
 0x22c   : > { %1636 = vst.msk [vmem:[#allocation2 + $0xb8] sm:$0xff] %vm1612_vm8, %v1563_v29  ;;  %1627 = vst.msk [vmem:[#allocation2 + $0x70] sm:$0xff] %vm1612_vm8, %v1545_v30 }
 0x22f   : > { %v987_v59 = vpop.permute.xlu1 %986  ;;  %v1754_v38 = vpop.permute.xlu0 %1753 }
 0x230   : > { %1058 = vst.msk [vmem:[#allocation2 + $0xc8] sm:$0xff] %vm1032_vm5, %v987_v59 }
 0x231   : > { %1828 = vst.msk [vmem:[#allocation2 + $0xb0] sm:$0xff] %vm1805_vm9, %v1754_v38 }
 0x233   : > { %v1547_v61 = vpop.permute.xlu1 %1546  ;;  %v1178_v28 = vpop.permute.xlu0 %1177 }
 0x234   : > { %1628 = vst.msk [vmem:[#allocation2 + $0x78] sm:$0xff] %vm1612_vm8, %v1547_v61 }
 0x235   : > { %1250 = vst.msk [vmem:[#allocation2 + $0xc0] sm:$0xff] %vm1225_vm6, %v1178_v28 }
 0x237   : > { %v1756_v17 = vpop.permute.xlu1 %1755  ;;  %v1738_v43 = vpop.permute.xlu0 %1737 }
 0x238   : > { %v1860_v54 = vld [vmem:[#allocation2 + $0xb0] sm:$0xff]  ;;  %1829 = vst.msk [vmem:[#allocation2 + $0xb8] sm:$0xff] %vm1805_vm9, %v1756_v17  ;;  %1820 = vst.msk [vmem:[#allocation2 + $0x70] sm:$0xff] %vm1805_vm9, %v1738_v43 }
 0x239   : > { %2890 = vmatprep.mubr.msk.f32.mxu1 %vm1875_vm10, %v1860_v54 }
 0x23b   : > { %v1180_v20 = vpop.permute.xlu0 %1179  ;;  %v1372_v13 = vpop.permute.xlu1 %1371 }
 0x23c   : > { %1251 = vst.msk [vmem:[#allocation2 + $0xc8] sm:$0xff] %vm1225_vm6, %v1180_v20 }
 0x23d   : > { %1444 = vst.msk [vmem:[#allocation2 + $0xc0] sm:$0xff] %vm1419_vm7, %v1372_v13 }
 0x23f   : > { %v1740_v48 = vpop.permute.xlu0 %1739  ;;  %v1852_v19 = vld [vmem:[#allocation2 + $0x70] sm:$0xff]  ;;  %v1861_v49 = vld [vmem:[#allocation2 + $0xb8] sm:$0xff] }
 0x240   : > { %v1374_v5 = vpop.permute.xlu1 %1373  ;;  %1821 = vst.msk [vmem:[#allocation2 + $0x78] sm:$0xff] %vm1805_vm9, %v1740_v48  ;;  %2878 = vmatprep.mubr.msk.f32.mxu0 %vm1875_vm10, %v1852_v19  ;;  %2891 = vmatmul.mubr.msk.f32.gmra.mrb[6].mxu1 %vm1875_vm10, %v1861_v49 }
 0x241   : > { %1445 = vst.msk [vmem:[#allocation2 + $0xc8] sm:$0xff] %vm1419_vm7, %v1374_v5 }
 0x243   : > { %v1565_v60 = vpop.permute.xlu0 %1564 }
 0x244   : > { %v989_v4 = vpop.permute.xlu1 %988  ;;  %1637 = vst.msk [vmem:[#allocation2 + $0xc0] sm:$0xff] %vm1612_vm8, %v1565_v60 }
 0x245   : > { %1059 = vst.msk [vmem:[#allocation2 + $0xd0] sm:$0xff] %vm1032_vm5, %v989_v4 }
 0x247   : > { %v1567_v63 = vpop.permute.xlu0 %1566  ;;  %v1853_v52 = vld [vmem:[#allocation2 + $0x78] sm:$0xff] }
 0x248   : > { %v1758_v47 = vpop.permute.xlu1 %1757  ;;  %1638 = vst.msk [vmem:[#allocation2 + $0xc8] sm:$0xff] %vm1612_vm8, %v1567_v63  ;;  %2879 = vmatmul.mubr.msk.f32.gmra.mrb[14].mxu0 %vm1875_vm10, %v1853_v52 }
 0x249   : > { %1830 = vst.msk [vmem:[#allocation2 + $0xc0] sm:$0xff] %vm1805_vm9, %v1758_v47 }
 0x24b   : > { %v991_v23 = vpop.permute.xlu0 %990 }
 0x24c   : > { %v1182_v46 = vpop.permute.xlu1 %1181  ;;  %1060 = vst.msk [vmem:[#allocation2 + $0xd8] sm:$0xff] %vm1032_vm5, %v991_v23 }
 0x24d   : > { %1252 = vst.msk [vmem:[#allocation2 + $0xd0] sm:$0xff] %vm1225_vm6, %v1182_v46 }
 0x24f   : > { %v1760_v7 = vpop.permute.xlu0 %1759 }
 0x250   : > { %v1184_v22 = vpop.permute.xlu1 %1183  ;;  %v1862_v41 = vld [vmem:[#allocation2 + $0xc0] sm:$0xff]  ;;  %1831 = vst.msk [vmem:[#allocation2 + $0xc8] sm:$0xff] %vm1805_vm9, %v1760_v7 }
 0x251   : > { %1253 = vst.msk [vmem:[#allocation2 + $0xd8] sm:$0xff] %vm1225_vm6, %v1184_v22  ;;  %2893 = vmatprep.mubr.msk.f32.mxu1 %vm1875_vm10, %v1862_v41 }
 0x253   : > { %v1376_v33 = vpop.permute.xlu0 %1375  ;;  %v2859_v6 = vpop.f32.mrb[0].mxu0 }
 0x254   : > { %1446 = vst.msk [vmem:[#allocation2 + $0xd0] sm:$0xff] %vm1419_vm7, %v1376_v33  ;;  %v2269_v53 = vsel %vm2267_vm11, %v2859_v6, 0.0  ;;  %v2338_v51 = vmul.f32 %v2859_v6, %v2859_v6  ;;  %v1378_v56 = vpop.permute.xlu1 %1377  ;;  %v2042_v40 = vpop.f32.mrb[1].mxu0 }
 0x255   : > { %1447 = vst.msk [vmem:[#allocation2 + $0xd8] sm:$0xff] %vm1419_vm7, %v1378_v56  ;;  %v2268_v32 = vsel %vm2267_vm11, %v2042_v40, 0.0  ;;  %v2337_v25 = vmul.f32 %v2042_v40, %v2042_v40  ;;  %2201 = vxpose.xlu0.b32.start [1/16] (narrow) %v2042_v40, 8 }
 0x256   : > { %v2370_v50 = vsel %vm2267_vm11, %v2338_v51, 0.0  ;;  %v2270_v9 = vadd.f32 %v2269_v53, %v2268_v32 }
 0x257   : > { %v2369_v24 = vsel %vm2267_vm11, %v2337_v25, 0.0  ;;  %v1569_v57 = vpop.permute.xlu0 %1568  ;;  %v1863_v8 = vld [vmem:[#allocation2 + $0xc8] sm:$0xff] }
 0x258   : > { %v2371_v1 = vadd.f32 %v2370_v50, %v2369_v24  ;;  %1639 = vst.msk [vmem:[#allocation2 + $0xd0] sm:$0xff] %vm1612_vm8, %v1569_v57  ;;  %v993_v55 = vpop.permute.xlu1 %992  ;;  %2894 = vmatmul.mubr.msk.f32.gmra.mrb[8].mxu1 %vm1875_vm10, %v1863_v8 }
 0x259   : > { %1061 = vst.msk [vmem:[#allocation2 + $0xe0] sm:$0xff] %vm1032_vm5, %v993_v55  ;;  %2202 = vxpose.xlu0.b32.cont [2/16] (narrow) %v2859_v6, 8 }
 0x25b   : > { %v1571_v12 = vpop.permute.xlu0 %1570 }
 0x25c   : > { %1640 = vst.msk [vmem:[#allocation2 + $0xd8] sm:$0xff] %vm1612_vm8, %v1571_v12  ;;  %v1762_v27 = vpop.permute.xlu1 %1761 }
 0x25d   : > { %1832 = vst.msk [vmem:[#allocation2 + $0xd0] sm:$0xff] %vm1805_vm9, %v1762_v27 }
 0x25f   : > { %v995_v0 = vpop.permute.xlu0 %994 }
 0x260   : > { %1062 = vst.msk [vmem:[#allocation2 + $0xe8] sm:$0xff] %vm1032_vm5, %v995_v0  ;;  %v1186_v2 = vpop.permute.xlu1 %1185 }
 0x261   : > { %1254 = vst.msk [vmem:[#allocation2 + $0xe0] sm:$0xff] %vm1225_vm6, %v1186_v2 }
 0x263   : > { %v1764_v16 = vpop.permute.xlu0 %1763  ;;  %v2862_v34 = vpop.f32.mrb[2].mxu0 }
 0x264   : > { %1833 = vst.msk [vmem:[#allocation2 + $0xd8] sm:$0xff] %vm1805_vm9, %v1764_v16  ;;  %v1188_v11 = vpop.permute.xlu1 %1187  ;;  %v2052_v26 = vpop.f32.mrb[3].mxu0  ;;  %v1864_v3 = vld [vmem:[#allocation2 + $0xd0] sm:$0xff]  ;;  %v2340_v36 = vmul.f32 %v2862_v34, %v2862_v34  ;;  %v2273_v35 = vsel %vm2267_vm11, %v2862_v34, 0.0 }
 0x265   : > { %1255 = vst.msk [vmem:[#allocation2 + $0xe8] sm:$0xff] %vm1225_vm6, %v1188_v11  ;;  %v2271_v37 = vsel %vm2267_vm11, %v2052_v26, 0.0  ;;  %v2339_v58 = vmul.f32 %v2052_v26, %v2052_v26  ;;  %2896 = vmatprep.mubr.msk.f32.mxu1 %vm1875_vm10, %v1864_v3  ;;  %2203 = vxpose.xlu0.b32.cont [3/16] (narrow) %v2052_v26, 8 }
 0x266   : > { %v2272_v10 = vadd.f32 %v2271_v37, %v2270_v9  ;;  %v2374_v21 = vsel %vm2267_vm11, %v2340_v36, 0.0 }
 0x267   : > { %v2372_v44 = vsel %vm2267_vm11, %v2339_v58, 0.0  ;;  %v1380_v62 = vpop.permute.xlu0 %1379 }
 0x268   : > { %v2373_v14 = vadd.f32 %v2372_v44, %v2371_v1  ;;  %1448 = vst.msk [vmem:[#allocation2 + $0xe0] sm:$0xff] %vm1419_vm7, %v1380_v62  ;;  %v1382_v15 = vpop.permute.xlu1 %1381  ;;  %v2274_v18 = vadd.f32 %v2273_v35, %v2272_v10 }
 0x269   : > { %1449 = vst.msk [vmem:[#allocation2 + $0xe8] sm:$0xff] %vm1419_vm7, %v1382_v15  ;;  %2204 = vxpose.xlu0.b32.cont [4/16] (narrow) %v2862_v34, 8 }
 0x26a   : > { %v2375_v45 = vadd.f32 %v2374_v21, %v2373_v14 }
 0x26b   : > { %v1573_v39 = vpop.permute.xlu0 %1572  ;;  %v1865_v31 = vld [vmem:[#allocation2 + $0xd8] sm:$0xff] }
 0x26c   : > { %1641 = vst.msk [vmem:[#allocation2 + $0xe0] sm:$0xff] %vm1612_vm8, %v1573_v39  ;;  %v997_v42 = vpop.permute.xlu1 %996  ;;  %2897 = vmatmul.mubr.msk.f32.gmra.mrb[10].mxu1 %vm1875_vm10, %v1865_v31 }
 0x26d   : > { %1063 = vst.msk [vmem:[#allocation2 + $0xf0] sm:$0xff] %vm1032_vm5, %v997_v42 }
 0x26f   : > { %v1575_v29 = vpop.permute.xlu0 %1574 }
 0x270   : > { %1642 = vst.msk [vmem:[#allocation2 + $0xe8] sm:$0xff] %vm1612_vm8, %v1575_v29  ;;  %v1766_v30 = vpop.permute.xlu1 %1765 }
 0x271   : > { %1834 = vst.msk [vmem:[#allocation2 + $0xe0] sm:$0xff] %vm1805_vm9, %v1766_v30 }
 0x273   : > { %v999_v59 = vpop.permute.xlu0 %998  ;;  %v2865_v38 = vpop.f32.mrb[4].mxu0 }
 0x274   : > { %1064 = vst.msk [vmem:[#allocation2 + $0xf8] sm:$0xff] %vm1032_vm5, %v999_v59  ;;  %v1190_v61 = vpop.permute.xlu1 %1189  ;;  %v2062_v28 = vpop.f32.mrb[5].mxu0  ;;  %v2342_v17 = vmul.f32 %v2865_v38, %v2865_v38  ;;  %v2277_v13 = vsel %vm2267_vm11, %v2865_v38, 0.0 }
 0x275   : > { %1256 = vst.msk [vmem:[#allocation2 + $0xf0] sm:$0xff] %vm1225_vm6, %v1190_v61  ;;  %v2275_v43 = vsel %vm2267_vm11, %v2062_v28, 0.0  ;;  %v2341_v54 = vmul.f32 %v2062_v28, %v2062_v28  ;;  %2205 = vxpose.xlu0.b32.cont [5/16] (narrow) %v2062_v28, 8 }
 0x276   : > { %v2276_v20 = vadd.f32 %v2275_v43, %v2274_v18  ;;  %v2378_v63 = vsel %vm2267_vm11, %v2342_v17, 0.0 }
 0x277   : > { %v2376_v48 = vsel %vm2267_vm11, %v2341_v54, 0.0  ;;  %v1768_v5 = vpop.permute.xlu0 %1767 }
 0x278   : > { %v2377_v19 = vadd.f32 %v2376_v48, %v2375_v45  ;;  %1835 = vst.msk [vmem:[#allocation2 + $0xe8] sm:$0xff] %vm1805_vm9, %v1768_v5  ;;  %v1192_v49 = vpop.permute.xlu1 %1191  ;;  %v1866_v60 = vld [vmem:[#allocation2 + $0xe0] sm:$0xff]  ;;  %v2278_v4 = vadd.f32 %v2277_v13, %v2276_v20 }
 0x279   : > { %1257 = vst.msk [vmem:[#allocation2 + $0xf8] sm:$0xff] %vm1225_vm6, %v1192_v49  ;;  %2899 = vmatprep.mubr.msk.f32.mxu1 %vm1875_vm10, %v1866_v60  ;;  %2206 = vxpose.xlu0.b32.cont [6/16] (narrow) %v2865_v38, 8 }
 0x27a   : > { %v2379_v47 = vadd.f32 %v2378_v63, %v2377_v19 }
 0x27b   : > { %v1384_v52 = vpop.permute.xlu0 %1383 }
 0x27c   : > { %1450 = vst.msk [vmem:[#allocation2 + $0xf0] sm:$0xff] %vm1419_vm7, %v1384_v52  ;;  %v1386_v23 = vpop.permute.xlu1 %1385 }
 0x27d   : > { %1451 = vst.msk [vmem:[#allocation2 + $0xf8] sm:$0xff] %vm1419_vm7, %v1386_v23 }
 0x27f   : > { %v1577_v46 = vpop.permute.xlu0 %1576  ;;  %v1867_v7 = vld [vmem:[#allocation2 + $0xe8] sm:$0xff] }
 0x280   : > { %1643 = vst.msk [vmem:[#allocation2 + $0xf0] sm:$0xff] %vm1612_vm8, %v1577_v46  ;;  %v1579_v22 = vpop.permute.xlu1 %1578  ;;  %2900 = vmatmul.mubr.msk.f32.gmra.mrb[12].mxu1 %vm1875_vm10, %v1867_v7 }
 0x281   : > { %1644 = vst.msk [vmem:[#allocation2 + $0xf8] sm:$0xff] %vm1612_vm8, %v1579_v22 }
 0x283   : > { %v1770_v41 = vpop.permute.xlu0 %1769 }
 0x284   : > { %1836 = vst.msk [vmem:[#allocation2 + $0xf0] sm:$0xff] %vm1805_vm9, %v1770_v41  ;;  %v1772_v33 = vpop.permute.xlu1 %1771 }
 0x285   : > { %1837 = vst.msk [vmem:[#allocation2 + $0xf8] sm:$0xff] %vm1805_vm9, %v1772_v33 }
 0x28b   : > { %v2868_v6 = vpop.f32.mrb[6].mxu0  ;;  %v1868_v53 = vld [vmem:[#allocation2 + $0xf0] sm:$0xff] }
 0x28c   : > { %v2072_v51 = vpop.f32.mrb[7].mxu0  ;;  %2902 = vmatprep.mubr.msk.f32.mxu1 %vm1875_vm10, %v1868_v53  ;;  %v1869_v56 = vld [vmem:[#allocation2 + $0xf8] sm:$0xff]  ;;  %v2344_v40 = vmul.f32 %v2868_v6, %v2868_v6  ;;  %v2281_v9 = vsel %vm2267_vm11, %v2868_v6, 0.0 }
 0x28d   : > { %v2279_v32 = vsel %vm2267_vm11, %v2072_v51, 0.0  ;;  %v2343_v25 = vmul.f32 %v2072_v51, %v2072_v51  ;;  %2903 = vmatmul.mubr.msk.f32.gmra.mrb[14].mxu1 %vm1875_vm10, %v1869_v56  ;;  %2207 = vxpose.xlu0.b32.cont [7/16] (narrow) %v2072_v51, 8 }
 0x28e   : > { %v2280_v50 = vadd.f32 %v2279_v32, %v2278_v4  ;;  %v2382_v1 = vsel %vm2267_vm11, %v2344_v40, 0.0 }
 0x28f   : > { %v2380_v24 = vsel %vm2267_vm11, %v2343_v25, 0.0 }
 0x290   : > { %v2381_v57 = vadd.f32 %v2380_v24, %v2379_v47  ;;  %v2282_v8 = vadd.f32 %v2281_v9, %v2280_v50 }
 0x291   : > { %2208 = vxpose.xlu0.b32.cont [8/16] (narrow) %v2868_v6, 8 }
 0x292   : > { %v2383_v55 = vadd.f32 %v2382_v1, %v2381_v57 }
 0x2a7   : > { %v4079_v12 = vpop.f32.mrb[0].mxu1 }
 0x2a8   : > { %v4081_v27 = vpop.f32.mrb[1].mxu1  ;;  %v2354_v32 = vmul.f32 %v4079_v12, %v4079_v12  ;;  %v2301_v57 = vsel %vm2267_vm11, %v4079_v12, 0.0 }
 0x2a9   : > { %2233 = vxpose.xlu1.b32.start [1/16] (narrow) %v4081_v27, 8  ;;  %v2353_v6 = vmul.f32 %v4081_v27, %v4081_v27  ;;  %v2299_v25 = vsel %vm2267_vm11, %v4081_v27, 0.0 }
 0x2ad   : > { %2234 = vxpose.xlu1.b32.cont [2/16] (narrow) %v4079_v12, 8 }
 0x2af   : > { %v2871_v0 = vpop.f32.mrb[8].mxu0 }
 0x2b0   : > { %v2082_v2 = vpop.f32.mrb[9].mxu0  ;;  %v2346_v16 = vmul.f32 %v2871_v0, %v2871_v0  ;;  %v2285_v3 = vsel %vm2267_vm11, %v2871_v0, 0.0 }
 0x2b1   : > { %v2283_v34 = vsel %vm2267_vm11, %v2082_v2, 0.0  ;;  %v2345_v11 = vmul.f32 %v2082_v2, %v2082_v2  ;;  %2209 = vxpose.xlu0.b32.cont [9/16] (narrow) %v2082_v2, 8  ;;  %v2402_v2 = vsel %vm2267_vm11, %v2354_v32, 0.0 }
 0x2b2   : > { %v2284_v26 = vadd.f32 %v2283_v34, %v2282_v8  ;;  %v2386_v10 = vsel %vm2267_vm11, %v2346_v16, 0.0  ;;  %v2400_v8 = vsel %vm2267_vm11, %v2353_v6, 0.0 }
 0x2b3   : > { %v2384_v36 = vsel %vm2267_vm11, %v2345_v11, 0.0 }
 0x2b4   : > { %v2385_v37 = vadd.f32 %v2384_v36, %v2383_v55  ;;  %v2286_v58 = vadd.f32 %v2285_v3, %v2284_v26 }
 0x2b5   : > { %2210 = vxpose.xlu0.b32.cont [10/16] (narrow) %v2871_v0, 8 }
 0x2b6   : > { %v2387_v35 = vadd.f32 %v2386_v10, %v2385_v37 }
 0x2cb   : > { %v4089_v44 = vpop.f32.mrb[2].mxu1 }
 0x2cc   : > { %v4091_v62 = vpop.f32.mrb[3].mxu1  ;;  %v2356_v27 = vmul.f32 %v4089_v44, %v4089_v44  ;;  %v2305_v12 = vsel %vm2267_vm11, %v4089_v44, 0.0 }
 0x2cd   : > { %2235 = vxpose.xlu1.b32.cont [3/16] (narrow) %v4091_v62, 8  ;;  %v2355_v1 = vmul.f32 %v4091_v62, %v4091_v62  ;;  %v2303_v16 = vsel %vm2267_vm11, %v4091_v62, 0.0 }
 0x2cf   : > { %v2404_v26 = vsel %vm2267_vm11, %v2355_v1, 0.0 }
 0x2d1   : > { %2236 = vxpose.xlu1.b32.cont [4/16] (narrow) %v4089_v44, 8 }
 0x2d3   : > { %v2874_v14 = vpop.f32.mrb[10].mxu0 }
 0x2d4   : > { %v2092_v15 = vpop.f32.mrb[11].mxu0  ;;  %v2348_v18 = vmul.f32 %v2874_v14, %v2874_v14  ;;  %v2289_v31 = vsel %vm2267_vm11, %v2874_v14, 0.0 }
 0x2d5   : > { %v2287_v21 = vsel %vm2267_vm11, %v2092_v15, 0.0  ;;  %v2347_v45 = vmul.f32 %v2092_v15, %v2092_v15  ;;  %2211 = vxpose.xlu0.b32.cont [11/16] (narrow) %v2092_v15, 8 }
 0x2d6   : > { %v2288_v39 = vadd.f32 %v2287_v21, %v2286_v58  ;;  %v2390_v59 = vsel %vm2267_vm11, %v2348_v18, 0.0  ;;  %v2406_v58 = vsel %vm2267_vm11, %v2356_v27, 0.0 }
 0x2d7   : > { %v2388_v42 = vsel %vm2267_vm11, %v2347_v45, 0.0 }
 0x2d8   : > { %v2389_v29 = vadd.f32 %v2388_v42, %v2387_v35  ;;  %v2290_v30 = vadd.f32 %v2289_v31, %v2288_v39 }
 0x2d9   : > { %2212 = vxpose.xlu0.b32.cont [12/16] (narrow) %v2874_v14, 8 }
 0x2da   : > { %v2391_v38 = vadd.f32 %v2390_v59, %v2389_v29 }
 0x2ef   : > { %v2889_v61 = vpop.f32.mrb[4].mxu1 }
 0x2f0   : > { %v2142_v28 = vpop.f32.mrb[5].mxu1  ;;  %v2358_v10 = vmul.f32 %v2889_v61, %v2889_v61  ;;  %v2309_v18 = vsel %vm2267_vm11, %v2889_v61, 0.0 }
 0x2f1   : > { %2237 = vxpose.xlu1.b32.cont [5/16] (narrow) %v2142_v28, 8  ;;  %v2357_v3 = vmul.f32 %v2142_v28, %v2142_v28  ;;  %v2307_v35 = vsel %vm2267_vm11, %v2142_v28, 0.0 }
 0x2f2   : > { %v2410_v42 = vsel %vm2267_vm11, %v2358_v10, 0.0 }
 0x2f3   : > { %v2408_v62 = vsel %vm2267_vm11, %v2357_v3, 0.0 }
 0x2f5   : > { %2238 = vxpose.xlu1.b32.cont [6/16] (narrow) %v2889_v61, 8 }
 0x2f7   : > { %v2877_v17 = vpop.f32.mrb[12].mxu0 }
 0x2f8   : > { %v2102_v43 = vpop.f32.mrb[13].mxu0  ;;  %v2350_v54 = vmul.f32 %v2877_v17, %v2877_v17  ;;  %v2293_v5 = vsel %vm2267_vm11, %v2877_v17, 0.0 }
 0x2f9   : > { %v2291_v20 = vsel %vm2267_vm11, %v2102_v43, 0.0  ;;  %v2349_v13 = vmul.f32 %v2102_v43, %v2102_v43  ;;  %2213 = vxpose.xlu0.b32.cont [13/16] (narrow) %v2102_v43, 8 }
 0x2fa   : > { %v2292_v48 = vadd.f32 %v2291_v20, %v2290_v30  ;;  %v2394_v4 = vsel %vm2267_vm11, %v2350_v54, 0.0 }
 0x2fb   : > { %v2392_v19 = vsel %vm2267_vm11, %v2349_v13, 0.0 }
 0x2fc   : > { %v2393_v49 = vadd.f32 %v2392_v19, %v2391_v38  ;;  %v2294_v60 = vadd.f32 %v2293_v5, %v2292_v48 }
 0x2fd   : > { %2214 = vxpose.xlu0.b32.cont [14/16] (narrow) %v2877_v17, 8 }
 0x2fe   : > { %v2395_v63 = vadd.f32 %v2394_v4, %v2393_v49 }
 0x313   : > { %v2892_v47 = vpop.f32.mrb[6].mxu1 }
 0x314   : > { %v2152_v52 = vpop.f32.mrb[7].mxu1  ;;  %v2360_v29 = vmul.f32 %v2892_v47, %v2892_v47  ;;  %v2313_v28 = vsel %vm2267_vm11, %v2892_v47, 0.0 }
 0x315   : > { %2239 = vxpose.xlu1.b32.cont [7/16] (narrow) %v2152_v52, 8  ;;  %v2359_v21 = vmul.f32 %v2152_v52, %v2152_v52  ;;  %v2311_v30 = vsel %vm2267_vm11, %v2152_v52, 0.0 }
 0x316   : > { %v2414_v20 = vsel %vm2267_vm11, %v2360_v29, 0.0 }
 0x317   : > { %v2412_v17 = vsel %vm2267_vm11, %v2359_v21, 0.0 }
 0x319   : > { %2240 = vxpose.xlu1.b32.cont [8/16] (narrow) %v2892_v47, 8 }
 0x31b   : > { %v2880_v23 = vpop.f32.mrb[14].mxu0 }
 0x31c   : > { %v2112_v46 = vpop.f32.mrb[15].mxu0  ;;  %v2352_v7 = vmul.f32 %v2880_v23, %v2880_v23  ;;  %v2297_v53 = vsel %vm2267_vm11, %v2880_v23, 0.0 }
 0x31d   : > { %v2295_v22 = vsel %vm2267_vm11, %v2112_v46, 0.0  ;;  %v2351_v41 = vmul.f32 %v2112_v46, %v2112_v46  ;;  %2215 = vxpose.xlu0.b32.cont [15/16] (narrow) %v2112_v46, 8 }
 0x31e   : > { %v2296_v33 = vadd.f32 %v2295_v22, %v2294_v60  ;;  %v2398_v50 = vsel %vm2267_vm11, %v2352_v7, 0.0 }
 0x31f   : > { %v2396_v51 = vsel %vm2267_vm11, %v2351_v41, 0.0 }
 0x320   : > { %v2298_v56 = vadd.f32 %v2297_v53, %v2296_v33  ;;  %v2397_v40 = vadd.f32 %v2396_v51, %v2395_v63 }
 0x321   : > { %2216 = vxpose.xlu0.b32.end [16/16] (narrow) %v2880_v23, 8 }
 0x322   : > { %v2300_v9 = vadd.f32 %v2299_v25, %v2298_v56  ;;  %v2399_v24 = vadd.f32 %v2398_v50, %v2397_v40 }
 0x324   : > { %v2302_v55 = vadd.f32 %v2301_v57, %v2300_v9  ;;  %v2401_v0 = vadd.f32 %v2400_v8, %v2399_v24 }
 0x326   : > { %v2304_v34 = vadd.f32 %v2303_v16, %v2302_v55  ;;  %v2403_v11 = vadd.f32 %v2402_v2, %v2401_v0 }
 0x328   : > { %v2306_v36 = vadd.f32 %v2305_v12, %v2304_v34  ;;  %v2405_v37 = vadd.f32 %v2404_v26, %v2403_v11 }
 0x32a   : > { %v2407_v14 = vadd.f32 %v2406_v58, %v2405_v37  ;;  %v2308_v15 = vadd.f32 %v2307_v35, %v2306_v36 }
 0x32b   : > { %v2895_v45 = vpop.f32.mrb[8].mxu1 }
 0x32c   : > { %v2162_v39 = vpop.f32.mrb[9].mxu1  ;;  %v2310_v44 = vadd.f32 %v2309_v18, %v2308_v15  ;;  %v2409_v31 = vadd.f32 %v2408_v62, %v2407_v14  ;;  %v2362_v13 = vmul.f32 %v2895_v45, %v2895_v45  ;;  %v2317_v49 = vsel %vm2267_vm11, %v2895_v45, 0.0 }
 0x32d   : > { %2241 = vxpose.xlu1.b32.cont [9/16] (narrow) %v2162_v39, 8  ;;  %v2361_v61 = vmul.f32 %v2162_v39, %v2162_v39  ;;  %v2315_v48 = vsel %vm2267_vm11, %v2162_v39, 0.0 }
 0x32e   : > { %v2312_v59 = vadd.f32 %v2311_v30, %v2310_v44  ;;  %v2411_v38 = vadd.f32 %v2410_v42, %v2409_v31  ;;  %v2418_v47 = vsel %vm2267_vm11, %v2362_v13, 0.0 }
 0x32f   : > { %v2416_v60 = vsel %vm2267_vm11, %v2361_v61, 0.0 }
 0x330   : > { %v2314_v43 = vadd.f32 %v2313_v28, %v2312_v59  ;;  %v2413_v54 = vadd.f32 %v2412_v17, %v2411_v38 }
 0x331   : > { %2242 = vxpose.xlu1.b32.cont [10/16] (narrow) %v2895_v45, 8 }
 0x332   : > { %v2316_v5 = vadd.f32 %v2315_v48, %v2314_v43  ;;  %v2415_v19 = vadd.f32 %v2414_v20, %v2413_v54 }
 0x334   : > { %v2417_v4 = vadd.f32 %v2416_v60, %v2415_v19  ;;  %v2318_v63 = vadd.f32 %v2317_v49, %v2316_v5 }
 0x336   : > { %v2419_v52 = vadd.f32 %v2418_v47, %v2417_v4 }
 0x33f   : > { %v2898_v23 = vpop.f32.mrb[10].mxu1 }
 0x340   : > { %v2172_v46 = vpop.f32.mrb[11].mxu1  ;;  %v2364_v7 = vmul.f32 %v2898_v23, %v2898_v23  ;;  %v2321_v6 = vsel %vm2267_vm11, %v2898_v23, 0.0 }
 0x341   : > { %v2319_v22 = vsel %vm2267_vm11, %v2172_v46, 0.0  ;;  %v2363_v41 = vmul.f32 %v2172_v46, %v2172_v46  ;;  %2243 = vxpose.xlu1.b32.cont [11/16] (narrow) %v2172_v46, 8 }
 0x342   : > { %v2320_v33 = vadd.f32 %v2319_v22, %v2318_v63  ;;  %v2422_v40 = vsel %vm2267_vm11, %v2364_v7, 0.0 }
 0x343   : > { %v2420_v53 = vsel %vm2267_vm11, %v2363_v41, 0.0 }
 0x344   : > { %v2421_v51 = vadd.f32 %v2420_v53, %v2419_v52  ;;  %v2322_v56 = vadd.f32 %v2321_v6, %v2320_v33 }
 0x345   : > { %2244 = vxpose.xlu1.b32.cont [12/16] (narrow) %v2898_v23, 8 }
 0x346   : > { %v2423_v32 = vadd.f32 %v2422_v40, %v2421_v51 }
 0x353   : > { %v2901_v25 = vpop.f32.mrb[12].mxu1 }
 0x354   : > { %v2182_v50 = vpop.f32.mrb[13].mxu1  ;;  %v2366_v9 = vmul.f32 %v2901_v25, %v2901_v25  ;;  %v2325_v1 = vsel %vm2267_vm11, %v2901_v25, 0.0 }
 0x355   : > { %v2323_v24 = vsel %vm2267_vm11, %v2182_v50, 0.0  ;;  %v2365_v57 = vmul.f32 %v2182_v50, %v2182_v50  ;;  %2245 = vxpose.xlu1.b32.cont [13/16] (narrow) %v2182_v50, 8 }
 0x356   : > { %v2324_v8 = vadd.f32 %v2323_v24, %v2322_v56  ;;  %v2426_v27 = vsel %vm2267_vm11, %v2366_v9, 0.0 }
 0x357   : > { %v2424_v55 = vsel %vm2267_vm11, %v2365_v57, 0.0 }
 0x358   : > { %v2425_v0 = vadd.f32 %v2424_v55, %v2423_v32  ;;  %v2326_v2 = vadd.f32 %v2325_v1, %v2324_v8 }
 0x359   : > { %2246 = vxpose.xlu1.b32.cont [14/16] (narrow) %v2901_v25, 8 }
 0x35a   : > { %v2427_v16 = vadd.f32 %v2426_v27, %v2425_v0 }
 0x360   : > { %v2904_v34 = vpop.f32.mrb[14].mxu1 }
 0x361   : > { %v2192_v11 = vpop.f32.mrb[15].mxu1  ;;  %v2368_v12 = vmul.f32 %v2904_v34, %v2904_v34  ;;  %v2329_v37 = vsel %vm2267_vm11, %v2904_v34, 0.0 }
 0x362   : > { %v2327_v26 = vsel %vm2267_vm11, %v2192_v11, 0.0  ;;  %v2367_v3 = vmul.f32 %v2192_v11, %v2192_v11  ;;  %2247 = vxpose.xlu1.b32.cont [15/16] (narrow) %v2192_v11, 8 }
 0x363   : > { %v2328_v36 = vadd.f32 %v2327_v26, %v2326_v2  ;;  %v2430_v15 = vsel %vm2267_vm11, %v2368_v12, 0.0 }
 0x364   : > { %v2428_v58 = vsel %vm2267_vm11, %v2367_v3, 0.0 }
 0x365   : > { %v2330_v10 = vadd.f32 %v2329_v37, %v2328_v36  ;;  %v2429_v35 = vadd.f32 %v2428_v58, %v2427_v16  ;;  %v2217_v14 = vpop.trf.xlu0 }
 0x366   : > { %2248 = vxpose.xlu1.b32.end [16/16] (narrow) %v2904_v34, 8  ;;  %2265 = vst [vmem:[%s218_s18] sm:$0xff] %v2217_v14 }
 0x367   : > { %v2331_v18 = vrot.slane %v2330_v10, 4  ;;  %v2431_v62 = vadd.f32 %v2430_v15, %v2429_v35 }
 0x369   : > { %v2332_v21 = vadd.f32 %v2331_v18, %v2330_v10  ;;  %v2432_v45 = vrot.slane %v2431_v62, 4 }
 0x36b   : > { %v2333_v39 = vrot.slane %v2332_v21, 2  ;;  %v2433_v44 = vadd.f32 %v2432_v45, %v2431_v62 }
 0x36d   : > { %v2334_v31 = vadd.f32 %v2333_v39, %v2332_v21  ;;  %v2434_v42 = vrot.slane %v2433_v44, 2 }
 0x36f   : > { %v2335_v29 = vrot.slane %v2334_v31, 1  ;;  %v2435_v30 = vadd.f32 %v2434_v42, %v2433_v44 }
 0x371   : > { %v2436_v59 = vrot.slane %v2435_v30, 1  ;;  %v2336_v38 = vadd.f32 %v2335_v29, %v2334_v31 }
 0x373   : > { %v2437_v28 = vadd.f32 %v2436_v59, %v2435_v30 }
 0x375   : > { %v2439_v17 = vsel %vm2438_vm12, %v2336_v38, %v2437_v28 }
 0x376   : > { %2441 = vst.msk [vmem:[%s226_s22] sm:$0x3] %vm2440_vm13, %v2439_v17 }
 0x3aa   : > { %v2249_v61 = vpop.trf.xlu1 }
 0x3ab   : > { %2266 = vst [vmem:[%s218_s18 + $0x8] sm:$0xff] %v2249_v61 }
 0x3ac PF: > { %s14_s14 = sadd.s32 1, %s2974_s14   ;;  %s4200_s12 = smov %s2970_s13 }
 0x3ad   : > { %p11_p5 = scmp.ge.s32.totalorder %s14_s14, 4   ;;  %s4201_s13 = smov %s4203_s15 }
 0x3af   :  { %13 = sbr.rel (!%p11_p5) target bundleno = 2 (0x2), region = 72 }

</bundles_post_ra>
